<compile_context>
chip_gen: v5e
topology: v5e:2x2
jax: 0.10.0
libtpu: 0.0.40
codegen_flags: <defaults>
</compile_context>

<pallas_src>
import jax
import jax.numpy as jnp
from jax.experimental import pallas as pl
from jax.experimental.pallas import tpu as pltpu


# ----------------------------------------------------------------------------- kernel
def _mlp_kernel(x_ref, w_ref, b_ref, out_ref):
    """Fused forward pass over one batch tile.

    x_ref:   (tile, P)   compute dtype (f32 or bf16), zero-padded features
    w_ref:   (L, P, P)   compute dtype, zero-padded packed weights
    b_ref:   (L, 1, P)   float32, zero-padded packed biases
    out_ref: (tile, P)   float32 (lane-dense padded slab; caller slices n_out)
    """
    n_layers = w_ref.shape[0]
    h = x_ref[...]
    for l in range(n_layers):                       # static unroll, 5 layers
        w = w_ref[l]                                # (P, P), static index
        y = jnp.dot(h.astype(w.dtype), w,
                    preferred_element_type=jnp.float32) + b_ref[l]
        h = jnp.maximum(y, 0.0) if l < n_layers - 1 else y
    out_ref[...] = h.astype(out_ref.dtype)


# ----------------------------------------------------------------------------- helpers
def _round_up(x, m):
    return m * pl.cdiv(x, m)


def _num_tensorcores():
    """Best-effort TensorCore-per-chip count (v5e/v6e: 1, v7x: 2)."""
    try:
        info = pltpu.get_tpu_info()
        for name in ("tensorcores_per_chip", "num_tensorcores", "num_cores",
                     "core_count"):
            v = getattr(info, name, None)
            if v:
                return int(v)
    except Exception:
        pass
    try:
        if "v7" in jax.devices()[0].device_kind.lower():
            return 2
    except Exception:
        pass
    return 1


def _pack_params(params, compute_dtype):
    """Zero-pad every layer to a common width P and stack into two arrays."""
    n_feature = params[0][0].shape[0]
    dims = [n_feature] + [w.shape[1] for (w, _) in params]
    P = int(_round_up(max(dims), 8))                # sublane-aligned common width
    w_blocks, b_blocks = [], []
    for (w, b) in params:
        d_in, d_out = w.shape
        w_blocks.append(jnp.pad(w, ((0, P - d_in), (0, P - d_out))))
        b_blocks.append(jnp.pad(b.reshape(1, -1), ((0, 0), (0, P - d_out))))
    w_packed = jnp.stack(w_blocks).astype(compute_dtype)    # (L, P, P)
    b_packed = jnp.stack(b_blocks).astype(jnp.float32)      # (L, 1, P)
    return w_packed, b_packed, P


def _choose_tile(B, batch_tile, row_align, num_cores):
    """Batch tile: one maximal tile on 1-TC chips, two 256-aligned tiles on v7x."""
    batch_tile = max(int(_round_up(batch_tile, 256)), 256)  # multiple of 256 (& 16)
    if num_cores >= 2 and B >= 512:
        # v7x: exactly one big step per core (best overhead amortization),
        # 256-row multiples to match the 2x256x256 MXU feed.
        tile = min(int(_round_up(pl.cdiv(B, num_cores), 256)), batch_tile)
    else:
        # v5e/v6e: serial grid -> a single tile whenever the batch fits the cap.
        tile = min(batch_tile, int(_round_up(B, row_align)))
    return max(tile, row_align)


# ----------------------------------------------------------------------------- wrapper
def make_multinet(params, *, use_bf16=False, batch_tile=2048, num_cores=None):
    """Pack parameters once and return a jitted forward(x) closure.

    params: list of (W, b), W of shape (d_in, d_out), b of shape (1, d_out);
            each layer computes x @ W + b (PyTorch Linear, W stored transposed).
    """
    compute_dtype = jnp.bfloat16 if use_bf16 else jnp.float32
    w_packed, b_packed, P = _pack_params(params, compute_dtype)
    n_layers = len(params)
    n_out = params[-1][0].shape[1]
    row_align = 16 if use_bf16 else 8               # bf16 packs 2 rows / sublane
    cores = _num_tensorcores() if num_cores is None else num_cores

    @jax.jit
    def forward(x):
        B, F = x.shape
        x_c = x.astype(compute_dtype)
        if F < P:
            x_c = jnp.pad(x_c, ((0, 0), (0, P - F)))

        tile = _choose_tile(B, batch_tile, row_align, cores)
        Bp = tile * pl.cdiv(B, tile)
        if Bp > B:
            x_c = jnp.pad(x_c, ((0, Bp - B), (0, 0)))
        grid = (Bp // tile,)

        # Advisory cost estimate (padded quantities actually moved / computed).
        flops = 2 * Bp * n_layers * P * P
        bytes_accessed = (Bp * P * x_c.dtype.itemsize          # x in
                          + Bp * P * 4                         # padded f32 out
                          + w_packed.size * w_packed.dtype.itemsize
                          + b_packed.size * b_packed.dtype.itemsize)
        cost = pl.CostEstimate(flops=flops, transcendentals=0,
                               bytes_accessed=bytes_accessed)

        # VMEM/step @ P=32, tile=2048, f32: ~0.5 MiB x (2-buffered in + out)
        # + ~50 KiB params -> far under every chip's scoped default.
        out = pl.pallas_call(
            _mlp_kernel,
            out_shape=jax.ShapeDtypeStruct((Bp, P), jnp.float32),
            grid_spec=pltpu.PrefetchScalarGridSpec(
                num_scalar_prefetch=0,
                grid=grid,
                in_specs=[
                    pl.BlockSpec((tile, P), lambda i: (i, 0)),           # x: batch-tiled
                    pl.BlockSpec(w_packed.shape, lambda i: (0, 0, 0)),   # weights: resident
                    pl.BlockSpec(b_packed.shape, lambda i: (0, 0, 0)),   # biases: resident
                ],
                out_specs=pl.BlockSpec((tile, P), lambda i: (i, 0)),     # lane-dense slab
            ),
            compiler_params=pltpu.CompilerParams(
                dimension_semantics=("parallel",)),
            cost_estimate=cost,
        )(x_c, w_packed, b_packed)

        return out[:B, :n_out]

    return forward


# ----------------------------------------------------------------------------- utilities
def init_params(key, n_feature, n_hidden, n_output):
    """Deterministic parameter init. Weights stored as (in_dim, out_dim)."""
    dims = [
        (n_feature, n_hidden),            # hidden1
        (n_hidden, n_hidden // 2),        # hidden2
        (n_hidden // 2, n_hidden // 4),   # hidden3
        (n_hidden // 4, n_hidden // 4),   # hidden4
        (n_hidden // 4, n_output),        # predict
    ]
    params = []
    for (d_in, d_out) in dims:
        key, kw, kb = jax.random.split(key, 3)
        bound = 1.0 / jnp.sqrt(d_in)      # PyTorch default U(-1/sqrt(in), 1/sqrt(in))
        w = jax.random.uniform(kw, (d_in, d_out), jnp.float32, -bound, bound)
        b = jax.random.uniform(kb, (1, d_out), jnp.float32, -bound, bound)
        params.append((w, b))
    return params


def reference_forward(x, params):
    """Plain-JAX reference for correctness checking."""
    h = x
    for i, (w, b) in enumerate(params):
        h = h @ w + b
        if i < len(params) - 1:
            h = jnp.maximum(h, 0.0)
    return h


# ----------------------------------------------------------------------------- demo
if __name__ == "__main__":
    n_feature, n_hidden, n_output = 32, 32, 4
    batch = 512

    key = jax.random.PRNGKey(0)
    key, kx = jax.random.split(key)
    x = jax.random.normal(kx, (batch, n_feature), jnp.float32)
    params = init_params(key, n_feature, n_hidden, n_output)

    ref = reference_forward(x, params)

    # f32 path (packing + chip-aware tiling done once here).
    fwd = make_multinet(params)
    out = jax.block_until_ready(fwd(x))
    assert out.shape == (batch, n_output)
    assert jnp.allclose(out, ref, atol=1e-5, rtol=1e-5), "f32 mismatch vs reference"

    # Ragged batch exercises the cdiv + zero-padding path.
    out_r = jax.block_until_ready(fwd(x[:300]))
    assert out_r.shape == (300, n_output)
    assert jnp.allclose(out_r, ref[:300], atol=1e-5, rtol=1e-5), "ragged-batch mismatch"

    # bf16 inputs/weights (halved HBM traffic, f32 accumulation) — looser tol.
    fwd_bf16 = make_multinet(params, use_bf16=True)
    out_bf16 = jax.block_until_ready(fwd_bf16(x))
    assert jnp.allclose(out_bf16, ref, atol=5e-2, rtol=5e-2), "bf16 mismatch vs reference"

    print("KERNEL_OK")
</pallas_src>

<mosaic_0001>
module attributes {stable_mosaic.version = 11 : i64} {
  func.func @_mlp_kernel(%arg0: i32, %arg1: memref<512x32xf32, #tpu.memory_space<vmem>>, %arg2: memref<5x32x32xf32, #tpu.memory_space<vmem>>, %arg3: memref<5x1x32xf32, #tpu.memory_space<vmem>>, %arg4: memref<512x32xf32, #tpu.memory_space<vmem>>) attributes {dimension_semantics = [#tpu.dimension_semantics<parallel>], iteration_bounds = array<i64: 1>, scalar_prefetch = 0 : i64, scratch_operands = 0 : i64, tpu.core_type = #tpu.core_type<tc>, window_params = [{transform_indices = @transform_0, window_bounds = array<i64: 512, 32>}, {pipeline_mode = #tpu.pipeline_mode<synchronous>, transform_indices = @transform_1, window_bounds = array<i64: 5, 32, 32>}, {pipeline_mode = #tpu.pipeline_mode<synchronous>, transform_indices = @transform_2, window_bounds = array<i64: 5, 1, 32>}, {transform_indices = @transform_3, window_bounds = array<i64: 512, 32>}]} {
    %c0 = arith.constant 0 : index
    %c0_0 = arith.constant 0 : index
    %0 = vector.load %arg1[%c0, %c0_0] : memref<512x32xf32, #tpu.memory_space<vmem>>, vector<512x32xf32>
    %c0_1 = arith.constant 0 : index
    %c0_2 = arith.constant 0 : index
    %c0_3 = arith.constant 0 : index
    %1 = vector.load %arg2[%c0_1, %c0_2, %c0_3] : memref<5x32x32xf32, #tpu.memory_space<vmem>>, vector<1x32x32xf32>
    %2 = vector.shape_cast %1 : vector<1x32x32xf32> to vector<32x32xf32>
    %cst = arith.constant dense<0.000000e+00> : vector<512x32xf32>
    %3 = tpu.matmul %0, %2, %cst {dimension_numbers = #tpu.dot_dimension_numbers<[1], [0], [0], [1], [0, 0, 1, 1], [], []>} : vector<512x32xf32>, vector<32x32xf32>, vector<512x32xf32> -> vector<512x32xf32>
    %c0_4 = arith.constant 0 : index
    %c0_5 = arith.constant 0 : index
    %c0_6 = arith.constant 0 : index
    %4 = vector.load %arg3[%c0_4, %c0_5, %c0_6] : memref<5x1x32xf32, #tpu.memory_space<vmem>>, vector<1x1x32xf32>
    %5 = vector.shape_cast %4 : vector<1x1x32xf32> to vector<1x32xf32>
    %6 = vector.broadcast %5 : vector<1x32xf32> to vector<512x32xf32>
    %7 = arith.addf %3, %6 : vector<512x32xf32>
    %cst_7 = arith.constant 0.000000e+00 : f32
    %8 = vector.broadcast %cst_7 : f32 to vector<512x32xf32>
    %9 = arith.maximumf %7, %8 : vector<512x32xf32>
    %c1 = arith.constant 1 : index
    %c0_8 = arith.constant 0 : index
    %c0_9 = arith.constant 0 : index
    %10 = vector.load %arg2[%c1, %c0_8, %c0_9] : memref<5x32x32xf32, #tpu.memory_space<vmem>>, vector<1x32x32xf32>
    %11 = vector.shape_cast %10 : vector<1x32x32xf32> to vector<32x32xf32>
    %cst_10 = arith.constant dense<0.000000e+00> : vector<512x32xf32>
    %12 = tpu.matmul %9, %11, %cst_10 {dimension_numbers = #tpu.dot_dimension_numbers<[1], [0], [0], [1], [0, 0, 1, 1], [], []>} : vector<512x32xf32>, vector<32x32xf32>, vector<512x32xf32> -> vector<512x32xf32>
    %c1_11 = arith.constant 1 : index
    %c0_12 = arith.constant 0 : index
    %c0_13 = arith.constant 0 : index
    %13 = vector.load %arg3[%c1_11, %c0_12, %c0_13] : memref<5x1x32xf32, #tpu.memory_space<vmem>>, vector<1x1x32xf32>
    %14 = vector.shape_cast %13 : vector<1x1x32xf32> to vector<1x32xf32>
    %15 = vector.broadcast %14 : vector<1x32xf32> to vector<512x32xf32>
    %16 = arith.addf %12, %15 : vector<512x32xf32>
    %cst_14 = arith.constant 0.000000e+00 : f32
    %17 = vector.broadcast %cst_14 : f32 to vector<512x32xf32>
    %18 = arith.maximumf %16, %17 : vector<512x32xf32>
    %c2 = arith.constant 2 : index
    %c0_15 = arith.constant 0 : index
    %c0_16 = arith.constant 0 : index
    %19 = vector.load %arg2[%c2, %c0_15, %c0_16] : memref<5x32x32xf32, #tpu.memory_space<vmem>>, vector<1x32x32xf32>
    %20 = vector.shape_cast %19 : vector<1x32x32xf32> to vector<32x32xf32>
    %cst_17 = arith.constant dense<0.000000e+00> : vector<512x32xf32>
    %21 = tpu.matmul %18, %20, %cst_17 {dimension_numbers = #tpu.dot_dimension_numbers<[1], [0], [0], [1], [0, 0, 1, 1], [], []>} : vector<512x32xf32>, vector<32x32xf32>, vector<512x32xf32> -> vector<512x32xf32>
    %c2_18 = arith.constant 2 : index
    %c0_19 = arith.constant 0 : index
    %c0_20 = arith.constant 0 : index
    %22 = vector.load %arg3[%c2_18, %c0_19, %c0_20] : memref<5x1x32xf32, #tpu.memory_space<vmem>>, vector<1x1x32xf32>
    %23 = vector.shape_cast %22 : vector<1x1x32xf32> to vector<1x32xf32>
    %24 = vector.broadcast %23 : vector<1x32xf32> to vector<512x32xf32>
    %25 = arith.addf %21, %24 : vector<512x32xf32>
    %cst_21 = arith.constant 0.000000e+00 : f32
    %26 = vector.broadcast %cst_21 : f32 to vector<512x32xf32>
    %27 = arith.maximumf %25, %26 : vector<512x32xf32>
    %c3 = arith.constant 3 : index
    %c0_22 = arith.constant 0 : index
    %c0_23 = arith.constant 0 : index
    %28 = vector.load %arg2[%c3, %c0_22, %c0_23] : memref<5x32x32xf32, #tpu.memory_space<vmem>>, vector<1x32x32xf32>
    %29 = vector.shape_cast %28 : vector<1x32x32xf32> to vector<32x32xf32>
    %cst_24 = arith.constant dense<0.000000e+00> : vector<512x32xf32>
    %30 = tpu.matmul %27, %29, %cst_24 {dimension_numbers = #tpu.dot_dimension_numbers<[1], [0], [0], [1], [0, 0, 1, 1], [], []>} : vector<512x32xf32>, vector<32x32xf32>, vector<512x32xf32> -> vector<512x32xf32>
    %c3_25 = arith.constant 3 : index
    %c0_26 = arith.constant 0 : index
    %c0_27 = arith.constant 0 : index
    %31 = vector.load %arg3[%c3_25, %c0_26, %c0_27] : memref<5x1x32xf32, #tpu.memory_space<vmem>>, vector<1x1x32xf32>
    %32 = vector.shape_cast %31 : vector<1x1x32xf32> to vector<1x32xf32>
    %33 = vector.broadcast %32 : vector<1x32xf32> to vector<512x32xf32>
    %34 = arith.addf %30, %33 : vector<512x32xf32>
    %cst_28 = arith.constant 0.000000e+00 : f32
    %35 = vector.broadcast %cst_28 : f32 to vector<512x32xf32>
    %36 = arith.maximumf %34, %35 : vector<512x32xf32>
    %c4 = arith.constant 4 : index
    %c0_29 = arith.constant 0 : index
    %c0_30 = arith.constant 0 : index
    %37 = vector.load %arg2[%c4, %c0_29, %c0_30] : memref<5x32x32xf32, #tpu.memory_space<vmem>>, vector<1x32x32xf32>
    %38 = vector.shape_cast %37 : vector<1x32x32xf32> to vector<32x32xf32>
    %cst_31 = arith.constant dense<0.000000e+00> : vector<512x32xf32>
    %39 = tpu.matmul %36, %38, %cst_31 {dimension_numbers = #tpu.dot_dimension_numbers<[1], [0], [0], [1], [0, 0, 1, 1], [], []>} : vector<512x32xf32>, vector<32x32xf32>, vector<512x32xf32> -> vector<512x32xf32>
    %c4_32 = arith.constant 4 : index
    %c0_33 = arith.constant 0 : index
    %c0_34 = arith.constant 0 : index
    %40 = vector.load %arg3[%c4_32, %c0_33, %c0_34] : memref<5x1x32xf32, #tpu.memory_space<vmem>>, vector<1x1x32xf32>
    %41 = vector.shape_cast %40 : vector<1x1x32xf32> to vector<1x32xf32>
    %42 = vector.broadcast %41 : vector<1x32xf32> to vector<512x32xf32>
    %43 = arith.addf %39, %42 : vector<512x32xf32>
    %c0_35 = arith.constant 0 : index
    %c0_36 = arith.constant 0 : index
    %44 = vector.load %arg4[%c0_35, %c0_36] : memref<512x32xf32, #tpu.memory_space<vmem>>, vector<512x32xf32>
    tpu.vector_store %arg4[%c0_35, %c0_36], %43 {strides = array<i32>} : memref<512x32xf32, #tpu.memory_space<vmem>>, vector<512x32xf32>,
    return
  }
  func.func @transform_0(%arg0: i32) -> (i32, i32) {
    %c0_i32 = arith.constant 0 : i32
    %c0_i32_0 = arith.constant 0 : i32
    return %arg0, %c0_i32 : i32, i32
  }
  func.func @transform_1(%arg0: i32) -> (i32, i32, i32) {
    %c0_i32 = arith.constant 0 : i32
    %c0_i32_0 = arith.constant 0 : i32
    %c0_i32_1 = arith.constant 0 : i32
    %c0_i32_2 = arith.constant 0 : i32
    return %c0_i32, %c0_i32_0, %c0_i32_1 : i32, i32, i32
  }
  func.func @transform_2(%arg0: i32) -> (i32, i32, i32) {
    %c0_i32 = arith.constant 0 : i32
    %c0_i32_0 = arith.constant 0 : i32
    %c0_i32_1 = arith.constant 0 : i32
    %c0_i32_2 = arith.constant 0 : i32
    return %c0_i32, %c0_i32_0, %c0_i32_1 : i32, i32, i32
  }
  func.func @transform_3(%arg0: i32) -> (i32, i32) {
    %c0_i32 = arith.constant 0 : i32
    %c0_i32_0 = arith.constant 0 : i32
    return %arg0, %c0_i32 : i32, i32
  }
}

</mosaic_0001>

<bundles_post_ra>
// kernel: forward.1
= control target key start
LH: loop header
LB: loop body
LE: loop exit
PB: predicated region body
PF: predicated region fallthrough
CT: control target
= control target key end

     0   :  { %vm86_vm0 = vcmask 261120   ;;  %s4161_s1 = inlined_call_operand.vmem [shape: f32[5,32,32], index: 1, kind: input, shape index: {}]   ;;  %s4162_s0 = inlined_call_operand.vmem [shape: f32[512,32], index: 0, kind: input, shape index: {}]   ;;  %s4163_s2 = inlined_call_operand.vmem [shape: f32[5,1,32], index: 2, kind: input, shape index: {}]   ;;  %s4164_s3 = inlined_call_operand.vmem [shape: f32[512,32], index: 3, kind: output, shape index: {}]  }
   0x1   :  { %v81_v0 = vld [vmem:[%s4161_s1 + $0x18] sm:$0xff]  ;;  %v80_v1 = vld [vmem:[%s4161_s1 + $0x10] sm:$0xff]  ;;  %v79_v2 = vld [vmem:[%s4161_s1 + $0x8] sm:$0xff] }
   0x2   :  { %291 = vmatpush.msra.mxu0 %v81_v0  ;;  %2796 = vmatpush.msra.mxu1 %v81_v0  ;;  %v78_v3 = vld [vmem:[%s4161_s1] sm:$0xff]  ;;  %v2523_v6 = vld [vmem:[%s4161_s1 + $0x38] sm:$0xff]  ;;  %v2522_v7 = vld [vmem:[%s4161_s1 + $0x30] sm:$0xff] }
   0x3   :  { %2797 = vmatpush.msra.mxu2 %v81_v0  ;;  %2798 = vmatpush.msra.mxu3 %v81_v0  ;;  %v14_v4 = vld [vmem:[%s4162_s0] sm:$0xff]  ;;  %v15_v8 = vld [vmem:[%s4162_s0 + $0x8] sm:$0xff]  ;;  %v16_v10 = vld [vmem:[%s4162_s0 + $0x10] sm:$0xff] }
   0x4   :  { %292 = vmatpush.msra.mxu0 %v80_v1  ;;  %2799 = vmatpush.msra.mxu1 %v80_v1  ;;  %v30_v5 = vld [vmem:[%s4162_s0 + $0x80] sm:$0xff]  ;;  %v31_v9 = vld [vmem:[%s4162_s0 + $0x88] sm:$0xff]  ;;  %v32_v11 = vld [vmem:[%s4162_s0 + $0x90] sm:$0xff] }
   0x5   :  { %2800 = vmatpush.msra.mxu2 %v80_v1  ;;  %2801 = vmatpush.msra.mxu3 %v80_v1  ;;  %v17_v12 = vld [vmem:[%s4162_s0 + $0x18] sm:$0xff]  ;;  %v18_v14 = vld [vmem:[%s4162_s0 + $0x20] sm:$0xff]  ;;  %v2521_v16 = vld [vmem:[%s4161_s1 + $0x28] sm:$0xff] }
   0x6   :  { %293 = vmatpush.msra.mxu0 %v79_v2  ;;  %2802 = vmatpush.msra.mxu1 %v79_v2  ;;  %v33_v13 = vld [vmem:[%s4162_s0 + $0x98] sm:$0xff]  ;;  %v34_v15 = vld [vmem:[%s4162_s0 + $0xa0] sm:$0xff]  ;;  %v19_v17 = vld [vmem:[%s4162_s0 + $0x28] sm:$0xff] }
   0x7   :  { %2803 = vmatpush.msra.mxu2 %v79_v2  ;;  %2804 = vmatpush.msra.mxu3 %v79_v2  ;;  %v35_v18 = vld [vmem:[%s4162_s0 + $0xa8] sm:$0xff]  ;;  %v20_v19 = vld [vmem:[%s4162_s0 + $0x30] sm:$0xff]  ;;  %v21_v21 = vld [vmem:[%s4162_s0 + $0x38] sm:$0xff] }
   0x8   :  { %294 = vmatpush.msra.mxu0 %v78_v3  ;;  %2805 = vmatpush.msra.mxu1 %v78_v3  ;;  %v36_v20 = vld [vmem:[%s4162_s0 + $0xb0] sm:$0xff]  ;;  %v37_v22 = vld [vmem:[%s4162_s0 + $0xb8] sm:$0xff]  ;;  %v22_v23 = vld [vmem:[%s4162_s0 + $0x40] sm:$0xff] }
   0x9   :  { %2456 = vmatmul.msk.f32.vlgmr.msra.gmra.mxu0 %vm86_vm0, %v14_v4  ;;  %2472 = vmatmul.msk.f32.vlgmr.msra.gmra.mxu1 %vm86_vm0, %v30_v5  ;;  %v38_v24 = vld [vmem:[%s4162_s0 + $0xc0] sm:$0xff]  ;;  %v23_v26 = vld [vmem:[%s4162_s0 + $0x48] sm:$0xff]  ;;  %v24_v28 = vld [vmem:[%s4162_s0 + $0x50] sm:$0xff] }
   0xa   :  { %766 = vmatpush.msrb.mxu1 %v2523_v6  ;;  %2806 = vmatpush.msra.mxu2 %v78_v3  ;;  %v2520_v25 = vld [vmem:[%s4161_s1 + $0x20] sm:$0xff]  ;;  %v39_v27 = vld [vmem:[%s4162_s0 + $0xc8] sm:$0xff]  ;;  %v40_v29 = vld [vmem:[%s4162_s0 + $0xd0] sm:$0xff] }
   0xb   :  { %2807 = vmatpush.msra.mxu3 %v78_v3  ;;  %v25_v30 = vld [vmem:[%s4162_s0 + $0x58] sm:$0xff]  ;;  %v26_v32 = vld [vmem:[%s4162_s0 + $0x60] sm:$0xff]  ;;  %v27_v36 = vld [vmem:[%s4162_s0 + $0x68] sm:$0xff] }
   0xc   :  { %767 = vmatpush.msrb.mxu1 %v2522_v7  ;;  %v41_v31 = vld [vmem:[%s4162_s0 + $0xd8] sm:$0xff]  ;;  %v42_v33 = vld [vmem:[%s4162_s0 + $0xe0] sm:$0xff]  ;;  %v43_v37 = vld [vmem:[%s4162_s0 + $0xe8] sm:$0xff] }
   0xd   :  { %v46_v34 = vld [vmem:[%s4162_s0 + $0x100] sm:$0xff]  ;;  %v2592_v35 = vld [vmem:[%s4161_s1 + $0x58] sm:$0xff]  ;;  %v47_v38 = vld [vmem:[%s4162_s0 + $0x108] sm:$0xff] }
   0xe   :  { %768 = vmatpush.msrb.mxu1 %v2521_v16  ;;  %2488 = vmatmul.msk.f32.vlgmr.msra.gmra.mxu2 %vm86_vm0, %v46_v34  ;;  %v28_v39 = vld [vmem:[%s4162_s0 + $0x70] sm:$0xff]  ;;  %v29_v42 = vld [vmem:[%s4162_s0 + $0x78] sm:$0xff]  ;;  %v3008_v44 = vld [vmem:[%s4163_s2] ss:$0 sm:$0xff] }
   0xf   :  { %1241 = vmatpush.msrb.mxu2 %v2592_v35  ;;  %v44_v40 = vld [vmem:[%s4162_s0 + $0xf0] sm:$0xff]  ;;  %v45_v43 = vld [vmem:[%s4162_s0 + $0xf8] sm:$0xff]  ;;  %v50_v50 = vld [vmem:[%s4162_s0 + $0x120] sm:$0xff] }
  0x10   :  { %769 = vmatpush.msrb.mxu1 %v2520_v25  ;;  %v48_v41 = vld [vmem:[%s4162_s0 + $0x110] sm:$0xff]  ;;  %v49_v45 = vld [vmem:[%s4162_s0 + $0x118] sm:$0xff]  ;;  %v51_v56 = vld [vmem:[%s4162_s0 + $0x128] sm:$0xff] }
  0x11   :  { %2457 = vmatmul.msk.f32.gmra.mxu0 %vm86_vm0, %v15_v8  ;;  %2473 = vmatmul.msk.f32.gmra.mxu1 %vm86_vm0, %v31_v9  ;;  %v2591_v51 = vld [vmem:[%s4161_s1 + $0x50] sm:$0xff]  ;;  %v53_v2 = vld [vmem:[%s4162_s0 + $0x138] sm:$0xff]  ;;  %v54_v7 = vld [vmem:[%s4162_s0 + $0x140] sm:$0xff] }
  0x12   :  { %1242 = vmatpush.msrb.mxu2 %v2591_v51  ;;  %v52_v61 = vld [vmem:[%s4162_s0 + $0x130] sm:$0xff]  ;;  %v2590_v8 = vld [vmem:[%s4161_s1 + $0x48] sm:$0xff] }
  0x13   :  { %v59_v34 = vld [vmem:[%s4162_s0 + $0x168] sm:$0xff] }
  0x14   :  { %1243 = vmatpush.msrb.mxu2 %v2590_v8  ;;  %v64_v8 = vld [vmem:[%s4162_s0 + $0x190] sm:$0xff] }
  0x16   :  { %2489 = vmatmul.msk.f32.gmra.mxu2 %vm86_vm0, %v47_v38 }
  0x19   :  { %2458 = vmatmul.msk.f32.gmra.mxu0 %vm86_vm0, %v16_v10  ;;  %2474 = vmatmul.msk.f32.gmra.mxu1 %vm86_vm0, %v32_v11 }
  0x1e   :  { %2490 = vmatmul.msk.f32.gmra.mxu2 %vm86_vm0, %v48_v41 }
  0x21   :  { %2459 = vmatmul.msk.f32.gmra.mxu0 %vm86_vm0, %v17_v12  ;;  %2475 = vmatmul.msk.f32.gmra.mxu1 %vm86_vm0, %v33_v13  ;;  %v55_v13 = vld [vmem:[%s4162_s0 + $0x148] sm:$0xff] }
  0x26   :  { %2491 = vmatmul.msk.f32.gmra.mxu2 %vm86_vm0, %v49_v45  ;;  %v61_v45 = vld [vmem:[%s4162_s0 + $0x178] sm:$0xff] }
  0x29   :  { %2460 = vmatmul.msk.f32.gmra.mxu0 %vm86_vm0, %v18_v14  ;;  %2476 = vmatmul.msk.f32.gmra.mxu1 %vm86_vm0, %v34_v15 }
  0x2e   :  { %2492 = vmatmul.msk.f32.gmra.mxu2 %vm86_vm0, %v50_v50 }
  0x31   :  { %2461 = vmatmul.msk.f32.gmra.mxu0 %vm86_vm0, %v19_v17  ;;  %2477 = vmatmul.msk.f32.gmra.mxu1 %vm86_vm0, %v35_v18  ;;  %v56_v18 = vld [vmem:[%s4162_s0 + $0x150] sm:$0xff] }
  0x36   :  { %2493 = vmatmul.msk.f32.gmra.mxu2 %vm86_vm0, %v51_v56 }
  0x39   :  { %2462 = vmatmul.msk.f32.gmra.mxu0 %vm86_vm0, %v20_v19  ;;  %2478 = vmatmul.msk.f32.gmra.mxu1 %vm86_vm0, %v36_v20 }
  0x3e   :  { %2494 = vmatmul.msk.f32.gmra.mxu2 %vm86_vm0, %v52_v61 }
  0x41   :  { %2463 = vmatmul.msk.f32.gmra.mxu0 %vm86_vm0, %v21_v21  ;;  %2479 = vmatmul.msk.f32.gmra.mxu1 %vm86_vm0, %v37_v22 }
  0x46   :  { %2495 = vmatmul.msk.f32.gmra.mxu2 %vm86_vm0, %v53_v2  ;;  %v63_v2 = vld [vmem:[%s4162_s0 + $0x188] sm:$0xff] }
  0x49   :  { %2464 = vmatmul.msk.f32.gmra.mxu0 %vm86_vm0, %v22_v23  ;;  %2480 = vmatmul.msk.f32.gmra.mxu1 %vm86_vm0, %v38_v24  ;;  %v57_v23 = vld [vmem:[%s4162_s0 + $0x158] sm:$0xff] }
  0x4e   :  { %2496 = vmatmul.msk.f32.gmra.mxu2 %vm86_vm0, %v54_v7 }
  0x51   :  { %2465 = vmatmul.msk.f32.gmra.mxu0 %vm86_vm0, %v23_v26  ;;  %2481 = vmatmul.msk.f32.gmra.mxu1 %vm86_vm0, %v39_v27 }
  0x56   :  { %2497 = vmatmul.msk.f32.gmra.mxu2 %vm86_vm0, %v55_v13 }
  0x59   :  { %2466 = vmatmul.msk.f32.gmra.mxu0 %vm86_vm0, %v24_v28  ;;  %2482 = vmatmul.msk.f32.gmra.mxu1 %vm86_vm0, %v40_v29  ;;  %v58_v28 = vld [vmem:[%s4162_s0 + $0x160] sm:$0xff] }
  0x5a   :  { %v2589_v29 = vld [vmem:[%s4161_s1 + $0x40] sm:$0xff] }
  0x5b   :  { %1244 = vmatpush.msrb.mxu2 %v2589_v29 }
  0x5e   :  { %2498 = vmatmul.msk.f32.gmra.mxu2 %vm86_vm0, %v56_v18  ;;  %v65_v18 = vld [vmem:[%s4162_s0 + $0x198] sm:$0xff] }
  0x61   :  { %2467 = vmatmul.msk.f32.gmra.mxu0 %vm86_vm0, %v25_v30  ;;  %2483 = vmatmul.msk.f32.gmra.mxu1 %vm86_vm0, %v41_v31 }
  0x66   :  { %2499 = vmatmul.msk.f32.gmra.mxu2 %vm86_vm0, %v57_v23 }
  0x69   :  { %2468 = vmatmul.msk.f32.gmra.mxu0 %vm86_vm0, %v26_v32  ;;  %2484 = vmatmul.msk.f32.gmra.mxu1 %vm86_vm0, %v42_v33 }
  0x6e   :  { %2500 = vmatmul.msk.f32.gmra.mxu2 %vm86_vm0, %v58_v28 }
  0x71   :  { %2469 = vmatmul.msk.f32.gmra.mxu0 %vm86_vm0, %v27_v36  ;;  %2485 = vmatmul.msk.f32.gmra.mxu1 %vm86_vm0, %v43_v37 }
  0x76   :  { %2501 = vmatmul.msk.f32.gmra.mxu2 %vm86_vm0, %v59_v34 }
  0x79   :  { %2470 = vmatmul.msk.f32.gmra.mxu0 %vm86_vm0, %v28_v39  ;;  %2486 = vmatmul.msk.f32.gmra.mxu1 %vm86_vm0, %v44_v40  ;;  %v60_v39 = vld [vmem:[%s4162_s0 + $0x170] sm:$0xff] }
  0x7e   :  { %2502 = vmatmul.msk.f32.gmra.mxu2 %vm86_vm0, %v60_v39 }
  0x81   :  { %2471 = vmatmul.msk.f32.gmra.mxu0 %vm86_vm0, %v29_v42  ;;  %2487 = vmatmul.msk.f32.gmra.mxu1 %vm86_vm0, %v45_v43 }
  0x86   :  { %v296_v46 = vpop.f32.mrf.mxu0  ;;  %v3014_v47 = vpop.f32.mrf.mxu1  ;;  %2503 = vmatmul.msk.f32.gmra.mxu2 %vm86_vm0, %v61_v45 }
  0x87   :  { %v297_v48 = vadd.f32 %v3008_v44, %v296_v46 }
  0x89   :  { %v488_v49 = vmax.f32 %v297_v48, 0.0 }
  0x8b   :  { %2525 = vmatmul.msk.f32.vlgmr.msrb.gmra.mxu1 %vm86_vm0, %v488_v49 }
  0x8e   :  { %v299_v52 = vpop.f32.mrf.mxu0  ;;  %v3025_v53 = vpop.f32.mrf.mxu1 }
  0x8f   :  { %v300_v54 = vadd.f32 %v3008_v44, %v299_v52 }
  0x91   :  { %v489_v55 = vmax.f32 %v300_v54, 0.0 }
  0x93   :  { %2526 = vmatmul.msk.f32.gmra.mxu1 %vm86_vm0, %v489_v55  ;;  %v3126_v55 = vpop.f32.mrf.mxu2 }
  0x96   :  { %v302_v57 = vpop.f32.mrf.mxu0  ;;  %v3033_v58 = vpop.f32.mrf.mxu1 }
  0x97   :  { %v303_v59 = vadd.f32 %v3008_v44, %v302_v57  ;;  %v62_v57 = vld [vmem:[%s4162_s0 + $0x180] sm:$0xff] }
  0x98   :  { %2504 = vmatmul.msk.f32.vlgmr.msra.gmra.mxu3 %vm86_vm0, %v62_v57 }
  0x99   :  { %v490_v60 = vmax.f32 %v303_v59, 0.0  ;;  %v2661_v59 = vld [vmem:[%s4161_s1 + $0x78] sm:$0xff] }
  0x9a   :  { %1716 = vmatpush.msrb.mxu3 %v2661_v59 }
  0x9b   :  { %2527 = vmatmul.msk.f32.gmra.mxu1 %vm86_vm0, %v490_v60 }
  0x9e   :  { %v305_v62 = vpop.f32.mrf.mxu0  ;;  %v3041_v63 = vpop.f32.mrf.mxu1 }
  0x9f   :  { %v306_v0 = vadd.f32 %v3008_v44, %v305_v62  ;;  %v354_v34 = vadd.f32 %v3008_v44, %v3041_v63 }
  0xa0   :  { %2505 = vmatmul.msk.f32.gmra.mxu3 %vm86_vm0, %v63_v2 }
  0xa1   :  { %v491_v1 = vmax.f32 %v306_v0, 0.0 }
  0xa3   :  { %2528 = vmatmul.msk.f32.gmra.mxu1 %vm86_vm0, %v491_v1  ;;  %v3139_v1 = vpop.f32.mrf.mxu2 }
  0xa6   :  { %v308_v3 = vpop.f32.mrf.mxu0  ;;  %v3049_v4 = vpop.f32.mrf.mxu1 }
  0xa7   :  { %v309_v5 = vadd.f32 %v3008_v44, %v308_v3  ;;  %v357_v63 = vadd.f32 %v3008_v44, %v3049_v4 }
  0xa8   :  { %2506 = vmatmul.msk.f32.gmra.mxu3 %vm86_vm0, %v64_v8 }
  0xa9   :  { %v492_v6 = vmax.f32 %v309_v5, 0.0  ;;  %v508_v45 = vmax.f32 %v357_v63, 0.0 }
  0xab   :  { %2529 = vmatmul.msk.f32.gmra.mxu1 %vm86_vm0, %v492_v6 }
  0xae   :  { %v311_v9 = vpop.f32.mrf.mxu0  ;;  %v3060_v10 = vpop.f32.mrf.mxu1 }
  0xaf   :  { %v312_v11 = vadd.f32 %v3008_v44, %v311_v9  ;;  %v3153_v9 = vpop.f32.mrf.mxu2  ;;  %v360_v4 = vadd.f32 %v3008_v44, %v3060_v10  ;;  %v2659_v10 = vld [vmem:[%s4161_s1 + $0x68] sm:$0xff] }
  0xb0   :  { %2507 = vmatmul.msk.f32.gmra.mxu3 %vm86_vm0, %v65_v18  ;;  %v72_v18 = vld [vmem:[%s4162_s0 + $0x1d0] sm:$0xff] }
  0xb1   :  { %v493_v12 = vmax.f32 %v312_v11, 0.0  ;;  %v345_v11 = vadd.f32 %v3008_v44, %v3014_v47  ;;  %v348_v47 = vadd.f32 %v3008_v44, %v3025_v53  ;;  %v351_v53 = vadd.f32 %v3008_v44, %v3033_v58  ;;  %v67_v58 = vld [vmem:[%s4162_s0 + $0x1a8] sm:$0xff] }
  0xb3   :  { %2530 = vmatmul.msk.f32.gmra.mxu1 %vm86_vm0, %v493_v12  ;;  %v3161_v12 = vld [vmem:[%s4163_s2 + $0x1] ss:$0 sm:$0xff] }
  0xb6   :  { %v314_v14 = vpop.f32.mrf.mxu0  ;;  %v3068_v15 = vpop.f32.mrf.mxu1 }
  0xb7   :  { %v315_v16 = vadd.f32 %v3008_v44, %v314_v14  ;;  %v504_v14 = vmax.f32 %v345_v11, 0.0 }
  0xb9   :  { %v494_v17 = vmax.f32 %v315_v16, 0.0 }
  0xbb   :  { %2531 = vmatmul.msk.f32.gmra.mxu1 %vm86_vm0, %v494_v17 }
  0xbe   :  { %v317_v19 = vpop.f32.mrf.mxu0  ;;  %v3076_v20 = vpop.f32.mrf.mxu1 }
  0xbf   :  { %v318_v21 = vadd.f32 %v3008_v44, %v317_v19  ;;  %v3172_v19 = vpop.f32.mrf.mxu2  ;;  %v366_v8 = vadd.f32 %v3008_v44, %v3076_v20 }
  0xc1   :  { %v495_v22 = vmax.f32 %v318_v21, 0.0 }
  0xc3   :  { %2532 = vmatmul.msk.f32.gmra.mxu1 %vm86_vm0, %v495_v22  ;;  %v505_v22 = vmax.f32 %v348_v47, 0.0 }
  0xc6   :  { %v320_v24 = vpop.f32.mrf.mxu0  ;;  %v3084_v25 = vpop.f32.mrf.mxu1 }
  0xc7   :  { %v321_v26 = vadd.f32 %v3008_v44, %v320_v24  ;;  %v3186_v29 = vpop.f32.mrf.mxu2  ;;  %v369_v20 = vadd.f32 %v3008_v44, %v3084_v25 }
  0xc9   :  { %v496_v27 = vmax.f32 %v321_v26, 0.0  ;;  %v66_v26 = vld [vmem:[%s4162_s0 + $0x1a0] sm:$0xff] }
  0xca   :  { %2508 = vmatmul.msk.f32.gmra.mxu3 %vm86_vm0, %v66_v26  ;;  %v73_v26 = vld [vmem:[%s4162_s0 + $0x1d8] sm:$0xff] }
  0xcb   :  { %2533 = vmatmul.msk.f32.gmra.mxu1 %vm86_vm0, %v496_v27  ;;  %v2660_v27 = vld [vmem:[%s4161_s1 + $0x70] sm:$0xff] }
  0xcc   :  { %1717 = vmatpush.msrb.mxu3 %v2660_v27 }
  0xce   :  { %v323_v30 = vpop.f32.mrf.mxu0  ;;  %v3095_v31 = vpop.f32.mrf.mxu1  ;;  %1718 = vmatpush.msrb.mxu3 %v2659_v10 }
  0xcf   :  { %v324_v32 = vadd.f32 %v3008_v44, %v323_v30  ;;  %v506_v30 = vmax.f32 %v351_v53, 0.0  ;;  %v3198_v39 = vpop.f32.mrf.mxu2  ;;  %v372_v25 = vadd.f32 %v3008_v44, %v3095_v31 }
  0xd1   :  { %v497_v33 = vmax.f32 %v324_v32, 0.0  ;;  %v513_v27 = vmax.f32 %v372_v25, 0.0 }
  0xd2   :  { %2509 = vmatmul.msk.f32.gmra.mxu3 %vm86_vm0, %v67_v58  ;;  %v2658_v58 = vld [vmem:[%s4161_s1 + $0x60] sm:$0xff] }
  0xd3   :  { %2534 = vmatmul.msk.f32.gmra.mxu1 %vm86_vm0, %v497_v33  ;;  %1719 = vmatpush.msrb.mxu3 %v2658_v58 }
  0xd6   :  { %v326_v35 = vpop.f32.mrf.mxu0  ;;  %v3103_v36 = vpop.f32.mrf.mxu1 }
  0xd7   :  { %v327_v37 = vadd.f32 %v3008_v44, %v326_v35  ;;  %v375_v31 = vadd.f32 %v3008_v44, %v3103_v36 }
  0xd9   :  { %v498_v38 = vmax.f32 %v327_v37, 0.0  ;;  %v507_v37 = vmax.f32 %v354_v34, 0.0 }
  0xdb   :  { %2535 = vmatmul.msk.f32.gmra.mxu1 %vm86_vm0, %v498_v38 }
  0xde   :  { %v329_v40 = vpop.f32.mrf.mxu0  ;;  %v3111_v41 = vpop.f32.mrf.mxu1 }
  0xdf   :  { %v330_v42 = vadd.f32 %v3008_v44, %v329_v40  ;;  %v378_v36 = vadd.f32 %v3008_v44, %v3111_v41 }
  0xe1   :  { %v499_v43 = vmax.f32 %v330_v42, 0.0  ;;  %v68_v42 = vld [vmem:[%s4162_s0 + $0x1b0] sm:$0xff] }
  0xe2   :  { %2510 = vmatmul.msk.f32.gmra.mxu3 %vm86_vm0, %v68_v42 }
  0xe3   :  { %2536 = vmatmul.msk.f32.gmra.mxu1 %vm86_vm0, %v499_v43 }
  0xe6   :  { %v332_v46 = vpop.f32.mrf.mxu0  ;;  %v3119_v48 = vpop.f32.mrf.mxu1 }
  0xe7   :  { %v333_v49 = vadd.f32 %v3008_v44, %v332_v46  ;;  %v381_v41 = vadd.f32 %v3008_v44, %v3119_v48 }
  0xe9   :  { %v500_v50 = vmax.f32 %v333_v49, 0.0 }
  0xeb   :  { %2537 = vmatmul.msk.f32.gmra.mxu1 %vm86_vm0, %v500_v50  ;;  %v69_v50 = vld [vmem:[%s4162_s0 + $0x1b8] sm:$0xff] }
  0xec   :  { %2511 = vmatmul.msk.f32.gmra.mxu3 %vm86_vm0, %v69_v50 }
  0xee   :  { %v335_v51 = vpop.f32.mrf.mxu0  ;;  %v3123_v52 = vpop.f32.mrf.mxu1 }
  0xef   :  { %v336_v54 = vadd.f32 %v3008_v44, %v335_v51  ;;  %v3213_v51 = vpop.f32.mrf.mxu2  ;;  %v384_v48 = vadd.f32 %v3008_v44, %v3123_v52 }
  0xf1   :  { %v501_v56 = vmax.f32 %v336_v54, 0.0 }
  0xf3   :  { %2538 = vmatmul.msk.f32.gmra.mxu1 %vm86_vm0, %v501_v56  ;;  %v509_v56 = vmax.f32 %v360_v4, 0.0 }
  0xf6   :  { %v338_v60 = vpop.f32.mrf.mxu0  ;;  %v3136_v61 = vpop.f32.mrf.mxu1 }
  0xf7   :  { %v339_v62 = vadd.f32 %v3008_v44, %v338_v60  ;;  %v70_v60 = vld [vmem:[%s4162_s0 + $0x1c0] sm:$0xff] }
  0xf8   :  { %2512 = vmatmul.msk.f32.gmra.mxu3 %vm86_vm0, %v70_v60 }
  0xf9   :  { %v502_v0 = vmax.f32 %v339_v62, 0.0  ;;  %v363_v62 = vadd.f32 %v3008_v44, %v3068_v15  ;;  %v71_v15 = vld [vmem:[%s4162_s0 + $0x1c8] sm:$0xff] }
  0xfb   :  { %2539 = vmatmul.msk.f32.gmra.mxu1 %vm86_vm0, %v502_v0  ;;  %v3231_v0 = vpop.f32.mrf.mxu2 }
  0xfe   :  { %v341_v3 = vpop.f32.mrf.mxu0  ;;  %v3146_v5 = vpop.f32.mrf.mxu1 }
  0xff   :  { %v342_v6 = vadd.f32 %v3008_v44, %v341_v3  ;;  %v510_v3 = vmax.f32 %v363_v62, 0.0  ;;  %v517_v62 = vmax.f32 %v384_v48, 0.0 }
 0x100   :  { %2513 = vmatmul.msk.f32.gmra.mxu3 %vm86_vm0, %v71_v15 }
 0x101   :  { %v503_v7 = vmax.f32 %v342_v6, 0.0 }
 0x103   :  { %2540 = vmatmul.msk.f32.gmra.mxu1 %vm86_vm0, %v503_v7 }
 0x108   :  { %v771_v13 = vpop.f32.mrf.mxu1  ;;  %2514 = vmatmul.msk.f32.gmra.mxu3 %vm86_vm0, %v72_v18 }
 0x109   :  { %v772_v16 = vadd.f32 %v3161_v12, %v771_v13  ;;  %v3242_v13 = vpop.f32.mrf.mxu2 }
 0x10b   :  { %v963_v17 = vmax.f32 %v772_v16, 0.0  ;;  %2541 = vmatmul.msk.f32.gmra.mxu1 %vm86_vm0, %v504_v14  ;;  %v511_v14 = vmax.f32 %v366_v8, 0.0 }
 0x10d   :  { %2594 = vmatmul.msk.f32.vlgmr.msrb.gmra.mxu2 %vm86_vm0, %v963_v17 }
 0x110   :  { %v774_v21 = vpop.f32.mrf.mxu1  ;;  %2515 = vmatmul.msk.f32.gmra.mxu3 %vm86_vm0, %v73_v26 }
 0x111   :  { %v775_v23 = vadd.f32 %v3161_v12, %v774_v21  ;;  %v512_v21 = vmax.f32 %v369_v20, 0.0 }
 0x113   :  { %v964_v24 = vmax.f32 %v775_v23, 0.0  ;;  %2542 = vmatmul.msk.f32.gmra.mxu1 %vm86_vm0, %v505_v22  ;;  %v3254_v23 = vpop.f32.mrf.mxu2 }
 0x115   :  { %2595 = vmatmul.msk.f32.gmra.mxu2 %vm86_vm0, %v964_v24 }
 0x118   :  { %v777_v28 = vpop.f32.mrf.mxu1 }
 0x119   :  { %v778_v32 = vadd.f32 %v3161_v12, %v777_v28 }
 0x11b   :  { %v965_v33 = vmax.f32 %v778_v32, 0.0  ;;  %2543 = vmatmul.msk.f32.gmra.mxu1 %vm86_vm0, %v506_v30  ;;  %v74_v32 = vld [vmem:[%s4162_s0 + $0x1e0] sm:$0xff]  ;;  %v3317_v8 = vpop.f32.mrf.mxu3 }
 0x11c   :  { %2516 = vmatmul.msk.f32.gmra.mxu3 %vm86_vm0, %v74_v32 }
 0x11d   :  { %2596 = vmatmul.msk.f32.gmra.mxu2 %vm86_vm0, %v965_v33  ;;  %v3269_v33 = vpop.f32.mrf.mxu2 }
 0x120   :  { %v780_v35 = vpop.f32.mrf.mxu1 }
 0x121   :  { %v781_v38 = vadd.f32 %v3161_v12, %v780_v35  ;;  %v514_v35 = vmax.f32 %v375_v31, 0.0 }
 0x123   :  { %v966_v40 = vmax.f32 %v781_v38, 0.0  ;;  %2544 = vmatmul.msk.f32.gmra.mxu1 %vm86_vm0, %v507_v37 }
 0x125   :  { %2597 = vmatmul.msk.f32.gmra.mxu2 %vm86_vm0, %v966_v40  ;;  %v75_v40 = vld [vmem:[%s4162_s0 + $0x1e8] sm:$0xff]  ;;  %v3287_v42 = vpop.f32.mrf.mxu2 }
 0x126   :  { %2517 = vmatmul.msk.f32.gmra.mxu3 %vm86_vm0, %v75_v40 }
 0x128   :  { %v783_v43 = vpop.f32.mrf.mxu1 }
 0x129   :  { %v784_v46 = vadd.f32 %v3161_v12, %v783_v43  ;;  %v515_v43 = vmax.f32 %v378_v36, 0.0 }
 0x12b   :  { %v967_v49 = vmax.f32 %v784_v46, 0.0  ;;  %2545 = vmatmul.msk.f32.gmra.mxu1 %vm86_vm0, %v508_v45 }
 0x12d   :  { %2598 = vmatmul.msk.f32.gmra.mxu2 %vm86_vm0, %v967_v49  ;;  %v76_v49 = vld [vmem:[%s4162_s0 + $0x1f0] sm:$0xff]  ;;  %v3298_v4 = vpop.f32.mrf.mxu2 }
 0x12e   :  { %2518 = vmatmul.msk.f32.gmra.mxu3 %vm86_vm0, %v76_v49 }
 0x130   :  { %v786_v54 = vpop.f32.mrf.mxu1 }
 0x131   :  { %v787_v57 = vadd.f32 %v3161_v12, %v786_v54  ;;  %v516_v54 = vmax.f32 %v381_v41, 0.0  ;;  %v2729_v41 = vld [vmem:[%s4161_s1 + $0x90] sm:$0xff] }
 0x133   :  { %v968_v59 = vmax.f32 %v787_v57, 0.0  ;;  %2546 = vmatmul.msk.f32.gmra.mxu1 %vm86_vm0, %v509_v56 }
 0x135   :  { %2599 = vmatmul.msk.f32.gmra.mxu2 %vm86_vm0, %v968_v59  ;;  %v77_v59 = vld [vmem:[%s4162_s0 + $0x1f8] sm:$0xff] }
 0x136   :  { %2519 = vmatmul.msk.f32.gmra.mxu3 %vm86_vm0, %v77_v59 }
 0x138   :  { %v789_v2 = vpop.f32.mrf.mxu1 }
 0x139   :  { %v790_v6 = vadd.f32 %v3161_v12, %v789_v2  ;;  %v3310_v2 = vpop.f32.mrf.mxu2 }
 0x13b   :  { %v969_v7 = vmax.f32 %v790_v6, 0.0  ;;  %2547 = vmatmul.msk.f32.gmra.mxu1 %vm86_vm0, %v510_v3  ;;  %v387_v6 = vadd.f32 %v3008_v44, %v3136_v61  ;;  %v2730_v61 = vld [vmem:[%s4161_s1 + $0x98] sm:$0xff] }
 0x13c   :  { %2191 = vmatpush.msrb.mxu0 %v2730_v61 }
 0x13d   :  { %2600 = vmatmul.msk.f32.gmra.mxu2 %vm86_vm0, %v969_v7  ;;  %v518_v15 = vmax.f32 %v387_v6, 0.0 }
 0x13e   :  { %2192 = vmatpush.msrb.mxu0 %v2729_v41 }
 0x140   :  { %v792_v11 = vpop.f32.mrf.mxu1 }
 0x141   :  { %v793_v16 = vadd.f32 %v3161_v12, %v792_v11 }
 0x143   :  { %v970_v17 = vmax.f32 %v793_v16, 0.0  ;;  %2548 = vmatmul.msk.f32.gmra.mxu1 %vm86_vm0, %v511_v14  ;;  %v3320_v14 = vpop.f32.mrf.mxu2  ;;  %v390_v16 = vadd.f32 %v3008_v44, %v3146_v5 }
 0x145   :  { %2601 = vmatmul.msk.f32.gmra.mxu2 %vm86_vm0, %v970_v17  ;;  %v519_v18 = vmax.f32 %v390_v16, 0.0 }
 0x148   :  { %v795_v47 = vpop.f32.mrf.mxu1 }
 0x149   :  { %v796_v22 = vadd.f32 %v3161_v12, %v795_v47 }
 0x14b   :  { %v971_v24 = vmax.f32 %v796_v22, 0.0  ;;  %2549 = vmatmul.msk.f32.gmra.mxu1 %vm86_vm0, %v512_v21  ;;  %v3330_v21 = vpop.f32.mrf.mxu3  ;;  %v393_v22 = vadd.f32 %v3008_v44, %v3126_v55  ;;  %v3335_v5 = vpop.f32.mrf.mxu2  ;;  %v3345_v55 = vld [vmem:[%s4163_s2 + $0x2] ss:$0 sm:$0xff] }
 0x14d   :  { %2602 = vmatmul.msk.f32.gmra.mxu2 %vm86_vm0, %v971_v24  ;;  %v520_v26 = vmax.f32 %v393_v22, 0.0 }
 0x150   :  { %v798_v53 = vpop.f32.mrf.mxu1 }
 0x151   :  { %v799_v28 = vadd.f32 %v3161_v12, %v798_v53 }
 0x153   :  { %v972_v30 = vmax.f32 %v799_v28, 0.0  ;;  %2550 = vmatmul.msk.f32.gmra.mxu1 %vm86_vm0, %v513_v27  ;;  %v396_v27 = vadd.f32 %v3008_v44, %v3139_v1  ;;  %v3347_v28 = vpop.f32.mrf.mxu3  ;;  %v399_v1 = vadd.f32 %v3008_v44, %v3153_v9  ;;  %v402_v9 = vadd.f32 %v3008_v44, %v3172_v19 }
 0x155   :  { %2603 = vmatmul.msk.f32.gmra.mxu2 %vm86_vm0, %v972_v30  ;;  %v521_v31 = vmax.f32 %v396_v27, 0.0 }
 0x158   :  { %v801_v34 = vpop.f32.mrf.mxu1 }
 0x159   :  { %v802_v37 = vadd.f32 %v3161_v12, %v801_v34 }
 0x15b   :  { %v973_v38 = vmax.f32 %v802_v37, 0.0  ;;  %2551 = vmatmul.msk.f32.gmra.mxu1 %vm86_vm0, %v514_v35 }
 0x15d   :  { %2604 = vmatmul.msk.f32.gmra.mxu2 %vm86_vm0, %v973_v38  ;;  %v3356_v38 = vpop.f32.mrf.mxu3 }
 0x160   :  { %v804_v63 = vpop.f32.mrf.mxu1 }
 0x161   :  { %v805_v45 = vadd.f32 %v3161_v12, %v804_v63  ;;  %v522_v63 = vmax.f32 %v399_v1, 0.0 }
 0x163   :  { %v974_v46 = vmax.f32 %v805_v45, 0.0  ;;  %2552 = vmatmul.msk.f32.gmra.mxu1 %vm86_vm0, %v515_v43 }
 0x165   :  { %2605 = vmatmul.msk.f32.gmra.mxu2 %vm86_vm0, %v974_v46  ;;  %v3370_v48 = vpop.f32.mrf.mxu3 }
 0x168   :  { %v807_v50 = vpop.f32.mrf.mxu1 }
 0x169   :  { %v808_v56 = vadd.f32 %v3161_v12, %v807_v50 }
 0x16b   :  { %v975_v57 = vmax.f32 %v808_v56, 0.0  ;;  %2553 = vmatmul.msk.f32.gmra.mxu1 %vm86_vm0, %v516_v54  ;;  %v523_v56 = vmax.f32 %v402_v9, 0.0 }
 0x16d   :  { %2606 = vmatmul.msk.f32.gmra.mxu2 %vm86_vm0, %v975_v57  ;;  %v3380_v16 = vpop.f32.mrf.mxu3 }
 0x170   :  { %v810_v60 = vpop.f32.mrf.mxu1 }
 0x171   :  { %v811_v10 = vadd.f32 %v3161_v12, %v810_v60 }
 0x173   :  { %v976_v3 = vmax.f32 %v811_v10, 0.0  ;;  %2554 = vmatmul.msk.f32.gmra.mxu1 %vm86_vm0, %v517_v62  ;;  %v405_v62 = vadd.f32 %v3008_v44, %v3186_v29  ;;  %v408_v29 = vadd.f32 %v3008_v44, %v3198_v39 }
 0x175   :  { %2607 = vmatmul.msk.f32.gmra.mxu2 %vm86_vm0, %v976_v3  ;;  %v524_v6 = vmax.f32 %v405_v62, 0.0  ;;  %v3393_v39 = vpop.f32.mrf.mxu3 }
 0x178   :  { %v813_v7 = vpop.f32.mrf.mxu1 }
 0x179   :  { %v814_v52 = vadd.f32 %v3161_v12, %v813_v7 }
 0x17b   :  { %v977_v11 = vmax.f32 %v814_v52, 0.0  ;;  %2555 = vmatmul.msk.f32.gmra.mxu1 %vm86_vm0, %v518_v15 }
 0x17d   :  { %2608 = vmatmul.msk.f32.gmra.mxu2 %vm86_vm0, %v977_v11 }
 0x180   :  { %v816_v17 = vpop.f32.mrf.mxu1 }
 0x181   :  { %v817_v20 = vadd.f32 %v3161_v12, %v816_v17 }
 0x183   :  { %v978_v47 = vmax.f32 %v817_v20, 0.0  ;;  %2556 = vmatmul.msk.f32.gmra.mxu1 %vm86_vm0, %v519_v18  ;;  %v525_v18 = vmax.f32 %v408_v29, 0.0 }
 0x185   :  { %2609 = vmatmul.msk.f32.gmra.mxu2 %vm86_vm0, %v978_v47 }
 0x188   :  { %v819_v24 = vpop.f32.mrf.mxu1 }
 0x189   :  { %v820_v25 = vadd.f32 %v3161_v12, %v819_v24 }
 0x18b   :  { %v979_v53 = vmax.f32 %v820_v25, 0.0  ;;  %2557 = vmatmul.msk.f32.gmra.mxu1 %vm86_vm0, %v520_v26  ;;  %v411_v26 = vadd.f32 %v3008_v44, %v3213_v51  ;;  %v414_v51 = vadd.f32 %v3008_v44, %v3231_v0 }
 0x18d   :  { %2610 = vmatmul.msk.f32.gmra.mxu2 %vm86_vm0, %v979_v53  ;;  %v526_v27 = vmax.f32 %v411_v26, 0.0 }
 0x190   :  { %v822_v30 = vpop.f32.mrf.mxu1  ;;  %v1246_v32 = vpop.f32.mrf.mxu2 }
 0x191   :  { %v823_v58 = vadd.f32 %v3161_v12, %v822_v30  ;;  %v1247_v34 = vadd.f32 %v3345_v55, %v1246_v32 }
 0x193   :  { %v980_v35 = vmax.f32 %v823_v58, 0.0  ;;  %v1438_v37 = vmax.f32 %v1247_v34, 0.0  ;;  %2558 = vmatmul.msk.f32.gmra.mxu1 %vm86_vm0, %v521_v31  ;;  %v2728_v34 = vld [vmem:[%s4161_s1 + $0x88] sm:$0xff] }
 0x194   :  { %2193 = vmatpush.msrb.mxu0 %v2728_v34 }
 0x195   :  { %2611 = vmatmul.msk.f32.gmra.mxu2 %vm86_vm0, %v980_v35  ;;  %2663 = vmatmul.msk.f32.vlgmr.msrb.gmra.mxu3 %vm86_vm0, %v1438_v37  ;;  %v3405_v35 = vpop.f32.mrf.mxu3 }
 0x198   :  { %v825_v40 = vpop.f32.mrf.mxu1  ;;  %v1249_v36 = vpop.f32.mrf.mxu2 }
 0x199   :  { %v826_v43 = vadd.f32 %v3161_v12, %v825_v40  ;;  %v1250_v45 = vadd.f32 %v3345_v55, %v1249_v36  ;;  %v527_v40 = vmax.f32 %v414_v51, 0.0 }
 0x19b   :  { %v981_v46 = vmax.f32 %v826_v43, 0.0  ;;  %v1439_v49 = vmax.f32 %v1250_v45, 0.0  ;;  %2559 = vmatmul.msk.f32.gmra.mxu1 %vm86_vm0, %v522_v63  ;;  %v417_v45 = vadd.f32 %v3008_v44, %v3242_v13  ;;  %v420_v13 = vadd.f32 %v3008_v44, %v3254_v23 }
 0x19c   :  { %v423_v23 = vadd.f32 %v3008_v44, %v3269_v33 }
 0x19d   :  { %2612 = vmatmul.msk.f32.gmra.mxu2 %vm86_vm0, %v981_v46  ;;  %2664 = vmatmul.msk.f32.gmra.mxu3 %vm86_vm0, %v1439_v49  ;;  %v528_v9 = vmax.f32 %v417_v45, 0.0 }
 0x1a0   :  { %v828_v50 = vpop.f32.mrf.mxu1  ;;  %v1252_v54 = vpop.f32.mrf.mxu2 }
 0x1a1   :  { %v829_v57 = vadd.f32 %v3161_v12, %v828_v50  ;;  %v1253_v59 = vadd.f32 %v3345_v55, %v1252_v54  ;;  %v3416_v54 = vpop.f32.mrf.mxu3 }
 0x1a3   :  { %v982_v60 = vmax.f32 %v829_v57, 0.0  ;;  %v1440_v19 = vmax.f32 %v1253_v59, 0.0  ;;  %2560 = vmatmul.msk.f32.gmra.mxu1 %vm86_vm0, %v523_v56 }
 0x1a5   :  { %2613 = vmatmul.msk.f32.gmra.mxu2 %vm86_vm0, %v982_v60  ;;  %2665 = vmatmul.msk.f32.gmra.mxu3 %vm86_vm0, %v1440_v19  ;;  %v529_v19 = vmax.f32 %v420_v13, 0.0 }
 0x1a8   :  { %v831_v10 = vpop.f32.mrf.mxu1  ;;  %v1255_v3 = vpop.f32.mrf.mxu2 }
 0x1a9   :  { %v832_v7 = vadd.f32 %v3161_v12, %v831_v10  ;;  %v1256_v15 = vadd.f32 %v3345_v55, %v1255_v3 }
 0x1ab   :  { %v983_v52 = vmax.f32 %v832_v7, 0.0  ;;  %v1441_v11 = vmax.f32 %v1256_v15, 0.0  ;;  %2561 = vmatmul.msk.f32.gmra.mxu1 %vm86_vm0, %v524_v6  ;;  %v3426_v7 = vpop.f32.mrf.mxu3 }
 0x1ad   :  { %2614 = vmatmul.msk.f32.gmra.mxu2 %vm86_vm0, %v983_v52  ;;  %2666 = vmatmul.msk.f32.gmra.mxu3 %vm86_vm0, %v1441_v11  ;;  %v530_v11 = vmax.f32 %v423_v23, 0.0 }
 0x1b0   :  { %v834_v61 = vpop.f32.mrf.mxu1  ;;  %v1258_v17 = vpop.f32.mrf.mxu2 }
 0x1b1   :  { %v835_v20 = vadd.f32 %v3161_v12, %v834_v61  ;;  %v1259_v47 = vadd.f32 %v3345_v55, %v1258_v17 }
 0x1b3   :  { %v984_v22 = vmax.f32 %v835_v20, 0.0  ;;  %v1442_v24 = vmax.f32 %v1259_v47, 0.0  ;;  %2562 = vmatmul.msk.f32.gmra.mxu1 %vm86_vm0, %v525_v18  ;;  %v426_v20 = vadd.f32 %v3008_v44, %v3287_v42  ;;  %v3439_v33 = vpop.f32.mrf.mxu3  ;;  %v2727_v47 = vld [vmem:[%s4161_s1 + $0x80] sm:$0xff] }
 0x1b4   :  { %2194 = vmatpush.msrb.mxu0 %v2727_v47 }
 0x1b5   :  { %2615 = vmatmul.msk.f32.gmra.mxu2 %vm86_vm0, %v984_v22  ;;  %2667 = vmatmul.msk.f32.gmra.mxu3 %vm86_vm0, %v1442_v24  ;;  %v531_v26 = vmax.f32 %v426_v20, 0.0 }
 0x1b8   :  { %v837_v25 = vpop.f32.mrf.mxu1  ;;  %v1261_v53 = vpop.f32.mrf.mxu2 }
 0x1b9   :  { %v838_v30 = vadd.f32 %v3161_v12, %v837_v25  ;;  %v1262_v32 = vadd.f32 %v3345_v55, %v1261_v53 }
 0x1bb   :  { %v985_v31 = vmax.f32 %v838_v30, 0.0  ;;  %v1443_v58 = vmax.f32 %v1262_v32, 0.0  ;;  %2563 = vmatmul.msk.f32.gmra.mxu1 %vm86_vm0, %v526_v27  ;;  %v429_v30 = vadd.f32 %v3008_v44, %v3298_v4  ;;  %v3451_v32 = vpop.f32.mrf.mxu3  ;;  %v432_v4 = vadd.f32 %v3008_v44, %v3310_v2 }
 0x1bc   :  { %v435_v2 = vadd.f32 %v3008_v44, %v3320_v14  ;;  %v438_v14 = vadd.f32 %v3008_v44, %v3335_v5 }
 0x1bd   :  { %2616 = vmatmul.msk.f32.gmra.mxu2 %vm86_vm0, %v985_v31  ;;  %2668 = vmatmul.msk.f32.gmra.mxu3 %vm86_vm0, %v1443_v58  ;;  %v532_v51 = vmax.f32 %v429_v30, 0.0 }
 0x1c0   :  { %v840_v37 = vpop.f32.mrf.mxu1  ;;  %v1264_v1 = vpop.f32.mrf.mxu2 }
 0x1c1   :  { %v841_v36 = vadd.f32 %v3161_v12, %v840_v37  ;;  %v1265_v63 = vadd.f32 %v3345_v55, %v1264_v1 }
 0x1c3   :  { %v986_v43 = vmax.f32 %v841_v36, 0.0  ;;  %v1444_v0 = vmax.f32 %v1265_v63, 0.0  ;;  %2564 = vmatmul.msk.f32.gmra.mxu1 %vm86_vm0, %v527_v40 }
 0x1c5   :  { %2617 = vmatmul.msk.f32.gmra.mxu2 %vm86_vm0, %v986_v43  ;;  %2669 = vmatmul.msk.f32.gmra.mxu3 %vm86_vm0, %v1444_v0  ;;  %v533_v43 = vmax.f32 %v432_v4, 0.0 }
 0x1c8   :  { %v843_v46 = vpop.f32.mrf.mxu1  ;;  %v1267_v49 = vpop.f32.mrf.mxu2 }
 0x1c9   :  { %v844_v41 = vadd.f32 %v3161_v12, %v843_v46  ;;  %v1268_v50 = vadd.f32 %v3345_v55, %v1267_v49  ;;  %v3462_v46 = vpop.f32.mrf.mxu3 }
 0x1cb   :  { %v987_v56 = vmax.f32 %v844_v41, 0.0  ;;  %v1445_v57 = vmax.f32 %v1268_v50, 0.0  ;;  %2565 = vmatmul.msk.f32.gmra.mxu1 %vm86_vm0, %v528_v9 }
 0x1cd   :  { %2618 = vmatmul.msk.f32.gmra.mxu2 %vm86_vm0, %v987_v56  ;;  %2670 = vmatmul.msk.f32.gmra.mxu3 %vm86_vm0, %v1445_v57  ;;  %v534_v56 = vmax.f32 %v435_v2, 0.0 }
 0x1d0   :  { %v846_v59 = vpop.f32.mrf.mxu1  ;;  %v1270_v60 = vpop.f32.mrf.mxu2 }
 0x1d1   :  { %v847_v62 = vadd.f32 %v3161_v12, %v846_v59  ;;  %v1271_v10 = vadd.f32 %v3345_v55, %v1270_v60 }
 0x1d3   :  { %v988_v3 = vmax.f32 %v847_v62, 0.0  ;;  %v1446_v6 = vmax.f32 %v1271_v10, 0.0  ;;  %2566 = vmatmul.msk.f32.gmra.mxu1 %vm86_vm0, %v529_v19  ;;  %v3472_v19 = vpop.f32.mrf.mxu3 }
 0x1d5   :  { %2619 = vmatmul.msk.f32.gmra.mxu2 %vm86_vm0, %v988_v3  ;;  %2671 = vmatmul.msk.f32.gmra.mxu3 %vm86_vm0, %v1446_v6  ;;  %v535_v3 = vmax.f32 %v438_v14, 0.0 }
 0x1d8   :  { %v849_v15 = vpop.f32.mrf.mxu1  ;;  %v1273_v52 = vpop.f32.mrf.mxu2 }
 0x1d9   :  { %v850_v29 = vadd.f32 %v3161_v12, %v849_v15  ;;  %v1274_v61 = vadd.f32 %v3345_v55, %v1273_v52 }
 0x1db   :  { %v989_v17 = vmax.f32 %v850_v29, 0.0  ;;  %v1447_v18 = vmax.f32 %v1274_v61, 0.0  ;;  %2567 = vmatmul.msk.f32.gmra.mxu1 %vm86_vm0, %v530_v11  ;;  %v441_v11 = vadd.f32 %v3008_v44, %v3317_v8  ;;  %v3485_v5 = vpop.f32.mrf.mxu3  ;;  %v444_v8 = vadd.f32 %v3008_v44, %v3330_v21 }
 0x1dc   :  { %v447_v21 = vadd.f32 %v3008_v44, %v3347_v28 }
 0x1dd   :  { %2620 = vmatmul.msk.f32.gmra.mxu2 %vm86_vm0, %v989_v17  ;;  %2672 = vmatmul.msk.f32.gmra.mxu3 %vm86_vm0, %v1447_v18  ;;  %v536_v17 = vmax.f32 %v441_v11, 0.0 }
 0x1e0   :  { %v852_v22 = vpop.f32.mrf.mxu1  ;;  %v1276_v24 = vpop.f32.mrf.mxu2 }
 0x1e1   :  { %v853_v25 = vadd.f32 %v3161_v12, %v852_v22  ;;  %v1277_v53 = vadd.f32 %v3345_v55, %v1276_v24 }
 0x1e3   :  { %v990_v27 = vmax.f32 %v853_v25, 0.0  ;;  %v1448_v42 = vmax.f32 %v1277_v53, 0.0  ;;  %2568 = vmatmul.msk.f32.gmra.mxu1 %vm86_vm0, %v531_v26  ;;  %v3494_v24 = vpop.f32.mrf.mxu3  ;;  %v537_v53 = vmax.f32 %v444_v8, 0.0 }
 0x1e5   :  { %2621 = vmatmul.msk.f32.gmra.mxu2 %vm86_vm0, %v990_v27  ;;  %2673 = vmatmul.msk.f32.gmra.mxu3 %vm86_vm0, %v1448_v42 }
 0x1e8   :  { %v855_v31 = vpop.f32.mrf.mxu1  ;;  %v1279_v58 = vpop.f32.mrf.mxu2 }
 0x1e9   :  { %v856_v34 = vadd.f32 %v3161_v12, %v855_v31  ;;  %v1280_v37 = vadd.f32 %v3345_v55, %v1279_v58  ;;  %v3506_v58 = vld [vmem:[%s4163_s2 + $0x3] ss:$0 sm:$0xff] }
 0x1eb   :  { %v991_v1 = vmax.f32 %v856_v34, 0.0  ;;  %v1449_v40 = vmax.f32 %v1280_v37, 0.0  ;;  %2569 = vmatmul.msk.f32.gmra.mxu1 %vm86_vm0, %v532_v51  ;;  %v538_v37 = vmax.f32 %v447_v21, 0.0 }
 0x1ed   :  { %2622 = vmatmul.msk.f32.gmra.mxu2 %vm86_vm0, %v991_v1  ;;  %2674 = vmatmul.msk.f32.gmra.mxu3 %vm86_vm0, %v1449_v40 }
 0x1f0   :  { %v858_v36 = vpop.f32.mrf.mxu1  ;;  %v1282_v63 = vpop.f32.mrf.mxu2 }
 0x1f1   :  { %v859_v0 = vadd.f32 %v3161_v12, %v858_v36  ;;  %v1283_v45 = vadd.f32 %v3345_v55, %v1282_v63 }
 0x1f3   :  { %v992_v49 = vmax.f32 %v859_v0, 0.0  ;;  %v1450_v9 = vmax.f32 %v1283_v45, 0.0  ;;  %2570 = vmatmul.msk.f32.gmra.mxu1 %vm86_vm0, %v533_v43  ;;  %v3515_v43 = vld [vmem:[%s4163_s2] ss:$0 sm:$0xff] }
 0x1f4   :  { %v450_v0 = vadd.f32 %v3515_v43, %v3356_v38  ;;  %v456_v11 = vadd.f32 %v3515_v43, %v3380_v16 }
 0x1f5   :  { %2623 = vmatmul.msk.f32.gmra.mxu2 %vm86_vm0, %v992_v49  ;;  %2675 = vmatmul.msk.f32.gmra.mxu3 %vm86_vm0, %v1450_v9 }
 0x1f6   :  { %v539_v9 = vmax.f32 %v450_v0, 0.0 }
 0x1f8   :  { %v861_v41 = vpop.f32.mrf.mxu1  ;;  %v1285_v50 = vpop.f32.mrf.mxu2 }
 0x1f9   :  { %v862_v57 = vadd.f32 %v3161_v12, %v861_v41  ;;  %v1286_v13 = vadd.f32 %v3345_v55, %v1285_v50 }
 0x1fb   :  { %v993_v59 = vmax.f32 %v862_v57, 0.0  ;;  %v1451_v60 = vmax.f32 %v1286_v13, 0.0  ;;  %2571 = vmatmul.msk.f32.gmra.mxu1 %vm86_vm0, %v534_v56 }
 0x1fd   :  { %2624 = vmatmul.msk.f32.gmra.mxu2 %vm86_vm0, %v993_v59  ;;  %2676 = vmatmul.msk.f32.gmra.mxu3 %vm86_vm0, %v1451_v60  ;;  %v453_v59 = vadd.f32 %v3515_v43, %v3370_v48 }
 0x200   :  { %v864_v62 = vpop.f32.mrf.mxu1  ;;  %v1288_v10 = vpop.f32.mrf.mxu2 }
 0x201   :  { %v865_v6 = vadd.f32 %v3161_v12, %v864_v62  ;;  %v1289_v23 = vadd.f32 %v3345_v55, %v1288_v10  ;;  %v540_v62 = vmax.f32 %v453_v59, 0.0 }
 0x203   :  { %v994_v15 = vmax.f32 %v865_v6, 0.0  ;;  %v1452_v52 = vmax.f32 %v1289_v23, 0.0  ;;  %2572 = vmatmul.msk.f32.gmra.mxu1 %vm86_vm0, %v535_v3 }
 0x205   :  { %2625 = vmatmul.msk.f32.gmra.mxu2 %vm86_vm0, %v994_v15  ;;  %2677 = vmatmul.msk.f32.gmra.mxu3 %vm86_vm0, %v1452_v52 }
 0x208   :  { %v867_v29 = vpop.f32.mrf.mxu1  ;;  %v1291_v61 = vpop.f32.mrf.mxu2 }
 0x209   :  { %v868_v18 = vadd.f32 %v3161_v12, %v867_v29  ;;  %v1292_v20 = vadd.f32 %v3345_v55, %v1291_v61 }
 0x20b   :  { %v995_v47 = vmax.f32 %v868_v18, 0.0  ;;  %v1453_v22 = vmax.f32 %v1292_v20, 0.0  ;;  %2573 = vmatmul.msk.f32.gmra.mxu1 %vm86_vm0, %v536_v17  ;;  %v541_v17 = vmax.f32 %v456_v11, 0.0 }
 0x20d   :  { %2626 = vmatmul.msk.f32.gmra.mxu2 %vm86_vm0, %v995_v47  ;;  %2678 = vmatmul.msk.f32.gmra.mxu3 %vm86_vm0, %v1453_v22 }
 0x210   :  { %v870_v26 = vpop.f32.mrf.mxu1  ;;  %v1294_v25 = vpop.f32.mrf.mxu2 }
 0x211   :  { %v871_v27 = vadd.f32 %v3161_v12, %v870_v26  ;;  %v1295_v42 = vadd.f32 %v3345_v55, %v1294_v25  ;;  %v459_v25 = vadd.f32 %v3515_v43, %v3393_v39 }
 0x213   :  { %v996_v30 = vmax.f32 %v871_v27, 0.0  ;;  %v1454_v31 = vmax.f32 %v1295_v42, 0.0  ;;  %2574 = vmatmul.msk.f32.gmra.mxu1 %vm86_vm0, %v537_v53  ;;  %v542_v42 = vmax.f32 %v459_v25, 0.0  ;;  %v474_v25 = vadd.f32 %v3515_v43, %v3451_v32 }
 0x215   :  { %2627 = vmatmul.msk.f32.gmra.mxu2 %vm86_vm0, %v996_v30  ;;  %2679 = vmatmul.msk.f32.gmra.mxu3 %vm86_vm0, %v1454_v31 }
 0x218   :  { %v873_v51 = vpop.f32.mrf.mxu1  ;;  %v1297_v34 = vpop.f32.mrf.mxu2 }
 0x219   :  { %v874_v1 = vadd.f32 %v3161_v12, %v873_v51  ;;  %v1298_v40 = vadd.f32 %v3345_v55, %v1297_v34  ;;  %v1721_v4 = vpop.f32.mrf.mxu3 }
 0x21a   :  { %v1722_v36 = vadd.f32 %v3506_v58, %v1721_v4 }
 0x21b   :  { %v997_v44 = vmax.f32 %v874_v1, 0.0  ;;  %v1455_v28 = vmax.f32 %v1298_v40, 0.0  ;;  %2575 = vmatmul.msk.f32.gmra.mxu1 %vm86_vm0, %v538_v37  ;;  %v462_v1 = vadd.f32 %v3515_v43, %v3405_v35 }
 0x21c   :  { %v1913_v63 = vmax.f32 %v1722_v36, 0.0 }
 0x21d   :  { %2628 = vmatmul.msk.f32.gmra.mxu2 %vm86_vm0, %v997_v44  ;;  %2680 = vmatmul.msk.f32.gmra.mxu3 %vm86_vm0, %v1455_v28  ;;  %v543_v36 = vmax.f32 %v462_v1, 0.0 }
 0x21e   :  { %2732 = vmatmul.msk.f32.vlgmr.msrb.gmra.mxu0 %vm86_vm0, %v1913_v63 }
 0x220   :  { %v876_v45 = vpop.f32.mrf.mxu1  ;;  %v1300_v49 = vpop.f32.mrf.mxu2 }
 0x221   :  { %v877_v2 = vadd.f32 %v3161_v12, %v876_v45  ;;  %v1301_v41 = vadd.f32 %v3345_v55, %v1300_v49  ;;  %v1724_v50 = vpop.f32.mrf.mxu3 }
 0x222   :  { %v1725_v56 = vadd.f32 %v3506_v58, %v1724_v50 }
 0x223   :  { %v998_v57 = vmax.f32 %v877_v2, 0.0  ;;  %v1456_v13 = vmax.f32 %v1301_v41, 0.0  ;;  %2576 = vmatmul.msk.f32.gmra.mxu1 %vm86_vm0, %v539_v9  ;;  %v465_v9 = vadd.f32 %v3515_v43, %v3416_v54 }
 0x224   :  { %v1914_v38 = vmax.f32 %v1725_v56, 0.0 }
 0x225   :  { %2629 = vmatmul.msk.f32.gmra.mxu2 %vm86_vm0, %v998_v57  ;;  %2681 = vmatmul.msk.f32.gmra.mxu3 %vm86_vm0, %v1456_v13  ;;  %v544_v50 = vmax.f32 %v465_v9, 0.0 }
 0x226   :  { %2733 = vmatmul.msk.f32.gmra.mxu0 %vm86_vm0, %v1914_v38 }
 0x228   :  { %v879_v60 = vpop.f32.mrf.mxu1  ;;  %v1303_v14 = vpop.f32.mrf.mxu2 }
 0x229   :  { %v880_v10 = vadd.f32 %v3161_v12, %v879_v60  ;;  %v1304_v3 = vadd.f32 %v3345_v55, %v1303_v14  ;;  %v1727_v6 = vpop.f32.mrf.mxu3  ;;  %v468_v14 = vadd.f32 %v3515_v43, %v3426_v7 }
 0x22a   :  { %v1728_v23 = vadd.f32 %v3506_v58, %v1727_v6 }
 0x22b   :  { %v999_v15 = vmax.f32 %v880_v10, 0.0  ;;  %v1457_v52 = vmax.f32 %v1304_v3, 0.0  ;;  %2577 = vmatmul.msk.f32.gmra.mxu1 %vm86_vm0, %v540_v62  ;;  %v545_v3 = vmax.f32 %v468_v14, 0.0 }
 0x22c   :  { %v1915_v48 = vmax.f32 %v1728_v23, 0.0 }
 0x22d   :  { %2630 = vmatmul.msk.f32.gmra.mxu2 %vm86_vm0, %v999_v15  ;;  %2682 = vmatmul.msk.f32.gmra.mxu3 %vm86_vm0, %v1457_v52 }
 0x22e   :  { %2734 = vmatmul.msk.f32.gmra.mxu0 %vm86_vm0, %v1915_v48 }
 0x230   :  { %v882_v29 = vpop.f32.mrf.mxu1  ;;  %v1306_v61 = vpop.f32.mrf.mxu2 }
 0x231   :  { %v883_v18 = vadd.f32 %v3161_v12, %v882_v29  ;;  %v1307_v20 = vadd.f32 %v3345_v55, %v1306_v61  ;;  %v1730_v47 = vpop.f32.mrf.mxu3  ;;  %v471_v29 = vadd.f32 %v3515_v43, %v3439_v33 }
 0x232   :  { %v1731_v22 = vadd.f32 %v3506_v58, %v1730_v47 }
 0x233   :  { %v1000_v8 = vmax.f32 %v883_v18, 0.0  ;;  %v1458_v26 = vmax.f32 %v1307_v20, 0.0  ;;  %2578 = vmatmul.msk.f32.gmra.mxu1 %vm86_vm0, %v541_v17  ;;  %v546_v18 = vmax.f32 %v471_v29, 0.0 }
 0x234   :  { %v1916_v16 = vmax.f32 %v1731_v22, 0.0 }
 0x235   :  { %2631 = vmatmul.msk.f32.gmra.mxu2 %vm86_vm0, %v1000_v8  ;;  %2683 = vmatmul.msk.f32.gmra.mxu3 %vm86_vm0, %v1458_v26 }
 0x236   :  { %2735 = vmatmul.msk.f32.gmra.mxu0 %vm86_vm0, %v1916_v16 }
 0x238   :  { %v885_v53 = vpop.f32.mrf.mxu1  ;;  %v1309_v27 = vpop.f32.mrf.mxu2 }
 0x239   :  { %v886_v30 = vadd.f32 %v3161_v12, %v885_v53  ;;  %v1310_v31 = vadd.f32 %v3345_v55, %v1309_v27  ;;  %v1733_v21 = vpop.f32.mrf.mxu3  ;;  %v547_v27 = vmax.f32 %v474_v25, 0.0 }
 0x23a   :  { %v1734_v51 = vadd.f32 %v3506_v58, %v1733_v21 }
 0x23b   :  { %v1001_v34 = vmax.f32 %v886_v30, 0.0  ;;  %v1459_v37 = vmax.f32 %v1310_v31, 0.0  ;;  %2579 = vmatmul.msk.f32.gmra.mxu1 %vm86_vm0, %v542_v42  ;;  %v3597_v42 = vld [vmem:[%s4163_s2 + $0x1] ss:$0 sm:$0xff] }
 0x23c   :  { %v1917_v39 = vmax.f32 %v1734_v51, 0.0 }
 0x23d   :  { %2632 = vmatmul.msk.f32.gmra.mxu2 %vm86_vm0, %v1001_v34  ;;  %2684 = vmatmul.msk.f32.gmra.mxu3 %vm86_vm0, %v1459_v37 }
 0x23e   :  { %2736 = vmatmul.msk.f32.gmra.mxu0 %vm86_vm0, %v1917_v39  ;;  %v477_v39 = vadd.f32 %v3515_v43, %v3462_v46 }
 0x240   :  { %v888_v40 = vpop.f32.mrf.mxu1  ;;  %v1312_v4 = vpop.f32.mrf.mxu2 }
 0x241   :  { %v889_v44 = vadd.f32 %v3161_v12, %v888_v40  ;;  %v1313_v28 = vadd.f32 %v3345_v55, %v1312_v4  ;;  %v1736_v63 = vpop.f32.mrf.mxu3  ;;  %v548_v4 = vmax.f32 %v477_v39, 0.0 }
 0x242   :  { %v1737_v0 = vadd.f32 %v3506_v58, %v1736_v63 }
 0x243   :  { %v1002_v45 = vmax.f32 %v889_v44, 0.0  ;;  %v1460_v49 = vmax.f32 %v1313_v28, 0.0  ;;  %2580 = vmatmul.msk.f32.gmra.mxu1 %vm86_vm0, %v543_v36 }
 0x244   :  { %v1918_v35 = vmax.f32 %v1737_v0, 0.0 }
 0x245   :  { %2633 = vmatmul.msk.f32.gmra.mxu2 %vm86_vm0, %v1002_v45  ;;  %2685 = vmatmul.msk.f32.gmra.mxu3 %vm86_vm0, %v1460_v49  ;;  %v480_v49 = vadd.f32 %v3515_v43, %v3472_v19 }
 0x246   :  { %2737 = vmatmul.msk.f32.gmra.mxu0 %vm86_vm0, %v1918_v35 }
 0x248   :  { %v891_v2 = vpop.f32.mrf.mxu1  ;;  %v1315_v41 = vpop.f32.mrf.mxu2 }
 0x249   :  { %v892_v56 = vadd.f32 %v3161_v12, %v891_v2  ;;  %v1316_v57 = vadd.f32 %v3345_v55, %v1315_v41  ;;  %v1739_v13 = vpop.f32.mrf.mxu3  ;;  %v549_v2 = vmax.f32 %v480_v49, 0.0 }
 0x24a   :  { %v1740_v38 = vadd.f32 %v3506_v58, %v1739_v13 }
 0x24b   :  { %v1003_v59 = vmax.f32 %v892_v56, 0.0  ;;  %v1461_v60 = vmax.f32 %v1316_v57, 0.0  ;;  %2581 = vmatmul.msk.f32.gmra.mxu1 %vm86_vm0, %v544_v50 }
 0x24c   :  { %v1919_v54 = vmax.f32 %v1740_v38, 0.0 }
 0x24d   :  { %2634 = vmatmul.msk.f32.gmra.mxu2 %vm86_vm0, %v1003_v59  ;;  %2686 = vmatmul.msk.f32.gmra.mxu3 %vm86_vm0, %v1461_v60  ;;  %v483_v59 = vadd.f32 %v3515_v43, %v3485_v5 }
 0x24e   :  { %2738 = vmatmul.msk.f32.gmra.mxu0 %vm86_vm0, %v1919_v54 }
 0x24f   :  { %v550_v14 = vmax.f32 %v483_v59, 0.0 }
 0x250   :  { %v894_v62 = vpop.f32.mrf.mxu1  ;;  %v1318_v10 = vpop.f32.mrf.mxu2 }
 0x251   :  { %v895_v6 = vadd.f32 %v3161_v12, %v894_v62  ;;  %v1319_v23 = vadd.f32 %v3345_v55, %v1318_v10  ;;  %v1742_v15 = vpop.f32.mrf.mxu3 }
 0x252   :  { %v1743_v52 = vadd.f32 %v3506_v58, %v1742_v15 }
 0x253   :  { %v1004_v48 = vmax.f32 %v895_v6, 0.0  ;;  %v1462_v11 = vmax.f32 %v1319_v23, 0.0  ;;  %2582 = vmatmul.msk.f32.gmra.mxu1 %vm86_vm0, %v545_v3 }
 0x254   :  { %v1920_v7 = vmax.f32 %v1743_v52, 0.0  ;;  %v486_v52 = vadd.f32 %v3515_v43, %v3494_v24 }
 0x255   :  { %2635 = vmatmul.msk.f32.gmra.mxu2 %vm86_vm0, %v1004_v48  ;;  %2687 = vmatmul.msk.f32.gmra.mxu3 %vm86_vm0, %v1462_v11 }
 0x256   :  { %2739 = vmatmul.msk.f32.gmra.mxu0 %vm86_vm0, %v1920_v7  ;;  %v551_v7 = vmax.f32 %v486_v52, 0.0 }
 0x258   :  { %v897_v61 = vpop.f32.mrf.mxu1  ;;  %v1321_v17 = vpop.f32.mrf.mxu2 }
 0x259   :  { %v898_v20 = vadd.f32 %v3161_v12, %v897_v61  ;;  %v1322_v47 = vadd.f32 %v3345_v55, %v1321_v17  ;;  %v1745_v22 = vpop.f32.mrf.mxu3 }
 0x25a   :  { %v1746_v8 = vadd.f32 %v3506_v58, %v1745_v22 }
 0x25b   :  { %v1005_v26 = vmax.f32 %v898_v20, 0.0  ;;  %v1463_v16 = vmax.f32 %v1322_v47, 0.0  ;;  %2583 = vmatmul.msk.f32.gmra.mxu1 %vm86_vm0, %v546_v18 }
 0x25c   :  { %v1921_v33 = vmax.f32 %v1746_v8, 0.0 }
 0x25d   :  { %2636 = vmatmul.msk.f32.gmra.mxu2 %vm86_vm0, %v1005_v26  ;;  %2688 = vmatmul.msk.f32.gmra.mxu3 %vm86_vm0, %v1463_v16 }
 0x25e   :  { %2740 = vmatmul.msk.f32.gmra.mxu0 %vm86_vm0, %v1921_v33 }
 0x260   :  { %v900_v12 = vpop.f32.mrf.mxu1  ;;  %v1324_v53 = vpop.f32.mrf.mxu2 }
 0x261   :  { %v901_v30 = vadd.f32 %v3597_v42, %v900_v12  ;;  %v1325_v31 = vadd.f32 %v3345_v55, %v1324_v53  ;;  %v1748_v21 = vpop.f32.mrf.mxu3 }
 0x262   :  { %v1749_v32 = vadd.f32 %v3506_v58, %v1748_v21 }
 0x263   :  { %v1006_v51 = vmax.f32 %v901_v30, 0.0  ;;  %v1464_v34 = vmax.f32 %v1325_v31, 0.0  ;;  %2584 = vmatmul.msk.f32.gmra.mxu1 %vm86_vm0, %v547_v27 }
 0x264   :  { %v1922_v37 = vmax.f32 %v1749_v32, 0.0 }
 0x265   :  { %2637 = vmatmul.msk.f32.gmra.mxu2 %vm86_vm0, %v1006_v51  ;;  %2689 = vmatmul.msk.f32.gmra.mxu3 %vm86_vm0, %v1464_v34 }
 0x266   :  { %2741 = vmatmul.msk.f32.gmra.mxu0 %vm86_vm0, %v1922_v37 }
 0x268   :  { %v903_v1 = vpop.f32.mrf.mxu1  ;;  %v1327_v40 = vpop.f32.mrf.mxu2 }
 0x269   :  { %v904_v36 = vadd.f32 %v3597_v42, %v903_v1  ;;  %v1328_v44 = vadd.f32 %v3345_v55, %v1327_v40  ;;  %v1751_v28 = vpop.f32.mrf.mxu3 }
 0x26a   :  { %v1752_v63 = vadd.f32 %v3506_v58, %v1751_v28 }
 0x26b   :  { %v1007_v0 = vmax.f32 %v904_v36, 0.0  ;;  %v1465_v45 = vmax.f32 %v1328_v44, 0.0  ;;  %2585 = vmatmul.msk.f32.gmra.mxu1 %vm86_vm0, %v548_v4  ;;  %v3657_v4 = vld [vmem:[%s4163_s2 + $0x4] ss:$0 sm:$0xff] }
 0x26c   :  { %v1923_v46 = vmax.f32 %v1752_v63, 0.0 }
 0x26d   :  { %2638 = vmatmul.msk.f32.gmra.mxu2 %vm86_vm0, %v1007_v0  ;;  %2690 = vmatmul.msk.f32.gmra.mxu3 %vm86_vm0, %v1465_v45 }
 0x26e   :  { %2742 = vmatmul.msk.f32.gmra.mxu0 %vm86_vm0, %v1923_v46 }
 0x270   :  { %v906_v35 = vpop.f32.mrf.mxu1  ;;  %v1330_v9 = vpop.f32.mrf.mxu2 }
 0x271   :  { %v907_v41 = vadd.f32 %v3597_v42, %v906_v35  ;;  %v1331_v50 = vadd.f32 %v3345_v55, %v1330_v9  ;;  %v1754_v56 = vpop.f32.mrf.mxu3 }
 0x272   :  { %v1755_v57 = vadd.f32 %v3506_v58, %v1754_v56 }
 0x273   :  { %v1008_v13 = vmax.f32 %v907_v41, 0.0  ;;  %v1466_v38 = vmax.f32 %v1331_v50, 0.0  ;;  %2586 = vmatmul.msk.f32.gmra.mxu1 %vm86_vm0, %v549_v2 }
 0x274   :  { %v1924_v19 = vmax.f32 %v1755_v57, 0.0 }
 0x275   :  { %2639 = vmatmul.msk.f32.gmra.mxu2 %vm86_vm0, %v1008_v13  ;;  %2691 = vmatmul.msk.f32.gmra.mxu3 %vm86_vm0, %v1466_v38 }
 0x276   :  { %2743 = vmatmul.msk.f32.gmra.mxu0 %vm86_vm0, %v1924_v19 }
 0x278   :  { %v909_v60 = vpop.f32.mrf.mxu1  ;;  %v1333_v54 = vpop.f32.mrf.mxu2 }
 0x279   :  { %v910_v62 = vadd.f32 %v3597_v42, %v909_v60  ;;  %v1334_v10 = vadd.f32 %v3345_v55, %v1333_v54  ;;  %v1757_v3 = vpop.f32.mrf.mxu3 }
 0x27a   :  { %v1758_v6 = vadd.f32 %v3506_v58, %v1757_v3 }
 0x27b   :  { %v1009_v23 = vmax.f32 %v910_v62, 0.0  ;;  %v1467_v15 = vmax.f32 %v1334_v10, 0.0  ;;  %2587 = vmatmul.msk.f32.gmra.mxu1 %vm86_vm0, %v550_v14 }
 0x27c   :  { %v1925_v5 = vmax.f32 %v1758_v6, 0.0 }
 0x27d   :  { %2640 = vmatmul.msk.f32.gmra.mxu2 %vm86_vm0, %v1009_v23  ;;  %2692 = vmatmul.msk.f32.gmra.mxu3 %vm86_vm0, %v1467_v15 }
 0x27e   :  { %2744 = vmatmul.msk.f32.gmra.mxu0 %vm86_vm0, %v1925_v5 }
 0x280   :  { %v912_v48 = vpop.f32.mrf.mxu1  ;;  %v1336_v11 = vpop.f32.mrf.mxu2 }
 0x281   :  { %v913_v29 = vadd.f32 %v3597_v42, %v912_v48  ;;  %v1337_v61 = vadd.f32 %v3345_v55, %v1336_v11  ;;  %v1760_v17 = vpop.f32.mrf.mxu3 }
 0x282   :  { %v1761_v18 = vadd.f32 %v3506_v58, %v1760_v17 }
 0x283   :  { %v1010_v20 = vmax.f32 %v913_v29, 0.0  ;;  %v1468_v47 = vmax.f32 %v1337_v61, 0.0  ;;  %2588 = vmatmul.msk.f32.gmra.mxu1 %vm86_vm0, %v551_v7 }
 0x284   :  { %v1926_v24 = vmax.f32 %v1761_v18, 0.0 }
 0x285   :  { %2641 = vmatmul.msk.f32.gmra.mxu2 %vm86_vm0, %v1010_v20  ;;  %2693 = vmatmul.msk.f32.gmra.mxu3 %vm86_vm0, %v1468_v47 }
 0x286   :  { %2745 = vmatmul.msk.f32.gmra.mxu0 %vm86_vm0, %v1926_v24 }
 0x288   :  { %v915_v43 = vpop.f32.mrf.mxu1  ;;  %v1339_v22 = vpop.f32.mrf.mxu2 }
 0x289   :  { %v916_v8 = vadd.f32 %v3597_v42, %v915_v43  ;;  %v1340_v26 = vadd.f32 %v3345_v55, %v1339_v22  ;;  %v1763_v16 = vpop.f32.mrf.mxu3 }
 0x28a   :  { %v1764_v33 = vadd.f32 %v3506_v58, %v1763_v16 }
 0x28b   :  { %v1011_v25 = vmax.f32 %v916_v8, 0.0  ;;  %v1469_v12 = vmax.f32 %v1340_v26, 0.0 }
 0x28c   :  { %v1927_v53 = vmax.f32 %v1764_v33, 0.0 }
 0x28d   :  { %2642 = vmatmul.msk.f32.gmra.mxu2 %vm86_vm0, %v1011_v25  ;;  %2694 = vmatmul.msk.f32.gmra.mxu3 %vm86_vm0, %v1469_v12 }
 0x28e   :  { %2746 = vmatmul.msk.f32.gmra.mxu0 %vm86_vm0, %v1927_v53 }
 0x290   :  { %v918_v27 = vpop.f32.mrf.mxu1  ;;  %v1342_v30 = vpop.f32.mrf.mxu2 }
 0x291   :  { %v919_v31 = vadd.f32 %v3597_v42, %v918_v27  ;;  %v1343_v21 = vadd.f32 %v3345_v55, %v1342_v30  ;;  %v1766_v32 = vpop.f32.mrf.mxu3 }
 0x292   :  { %v1767_v51 = vadd.f32 %v3506_v58, %v1766_v32 }
 0x293   :  { %v1012_v34 = vmax.f32 %v919_v31, 0.0  ;;  %v1470_v37 = vmax.f32 %v1343_v21, 0.0 }
 0x294   :  { %v1928_v39 = vmax.f32 %v1767_v51, 0.0 }
 0x295   :  { %2643 = vmatmul.msk.f32.gmra.mxu2 %vm86_vm0, %v1012_v34  ;;  %2695 = vmatmul.msk.f32.gmra.mxu3 %vm86_vm0, %v1470_v37  ;;  %v3718_v34 = vld [vmem:[%s4163_s2 + $0x2] ss:$0 sm:$0xff] }
 0x296   :  { %2747 = vmatmul.msk.f32.gmra.mxu0 %vm86_vm0, %v1928_v39 }
 0x298   :  { %v921_v1 = vpop.f32.mrf.mxu1  ;;  %v1345_v40 = vpop.f32.mrf.mxu2 }
 0x299   :  { %v922_v36 = vadd.f32 %v3597_v42, %v921_v1  ;;  %v1346_v44 = vadd.f32 %v3345_v55, %v1345_v40  ;;  %v1769_v28 = vpop.f32.mrf.mxu3 }
 0x29a   :  { %v1770_v63 = vadd.f32 %v3506_v58, %v1769_v28 }
 0x29b   :  { %v1013_v0 = vmax.f32 %v922_v36, 0.0  ;;  %v1471_v45 = vmax.f32 %v1346_v44, 0.0  ;;  %v2196_v46 = vpop.f32.mrf.mxu0 }
 0x29c   :  { %v1929_v49 = vmax.f32 %v1770_v63, 0.0  ;;  %v2197_v35 = vadd.f32 %v3657_v4, %v2196_v46 }
 0x29d   :  { %2644 = vmatmul.msk.f32.gmra.mxu2 %vm86_vm0, %v1013_v0  ;;  %2696 = vmatmul.msk.f32.gmra.mxu3 %vm86_vm0, %v1471_v45 }
 0x29e   :  { %2388 = vst.msk [vmem:[%s4164_s3] sm:$0xff] %vm86_vm0, %v2197_v35  ;;  %2748 = vmatmul.msk.f32.gmra.mxu0 %vm86_vm0, %v1929_v49 }
 0x2a0   :  { %v924_v9 = vpop.f32.mrf.mxu1  ;;  %v1348_v2 = vpop.f32.mrf.mxu2 }
 0x2a1   :  { %v925_v41 = vadd.f32 %v3597_v42, %v924_v9  ;;  %v1349_v50 = vadd.f32 %v3345_v55, %v1348_v2  ;;  %v1772_v56 = vpop.f32.mrf.mxu3 }
 0x2a2   :  { %v1773_v57 = vadd.f32 %v3506_v58, %v1772_v56 }
 0x2a3   :  { %v1014_v13 = vmax.f32 %v925_v41, 0.0  ;;  %v1472_v38 = vmax.f32 %v1349_v50, 0.0  ;;  %v2199_v19 = vpop.f32.mrf.mxu0 }
 0x2a4   :  { %v1930_v59 = vmax.f32 %v1773_v57, 0.0  ;;  %v2200_v60 = vadd.f32 %v3657_v4, %v2199_v19 }
 0x2a5   :  { %2645 = vmatmul.msk.f32.gmra.mxu2 %vm86_vm0, %v1014_v13  ;;  %2697 = vmatmul.msk.f32.gmra.mxu3 %vm86_vm0, %v1472_v38 }
 0x2a6   :  { %2389 = vst.msk [vmem:[%s4164_s3 + $0x8] sm:$0xff] %vm86_vm0, %v2200_v60  ;;  %2749 = vmatmul.msk.f32.gmra.mxu0 %vm86_vm0, %v1930_v59 }
 0x2a8   :  { %v927_v54 = vpop.f32.mrf.mxu1  ;;  %v1351_v14 = vpop.f32.mrf.mxu2 }
 0x2a9   :  { %v928_v62 = vadd.f32 %v3597_v42, %v927_v54  ;;  %v1352_v10 = vadd.f32 %v3345_v55, %v1351_v14  ;;  %v1775_v3 = vpop.f32.mrf.mxu3 }
 0x2aa   :  { %v1776_v6 = vadd.f32 %v3506_v58, %v1775_v3 }
 0x2ab   :  { %v1015_v23 = vmax.f32 %v928_v62, 0.0  ;;  %v1473_v15 = vmax.f32 %v1352_v10, 0.0  ;;  %v2202_v5 = vpop.f32.mrf.mxu0 }
 0x2ac   :  { %v1931_v52 = vmax.f32 %v1776_v6, 0.0  ;;  %v2203_v48 = vadd.f32 %v3657_v4, %v2202_v5 }
 0x2ad   :  { %2646 = vmatmul.msk.f32.gmra.mxu2 %vm86_vm0, %v1015_v23  ;;  %2698 = vmatmul.msk.f32.gmra.mxu3 %vm86_vm0, %v1473_v15 }
 0x2ae   :  { %2390 = vst.msk [vmem:[%s4164_s3 + $0x10] sm:$0xff] %vm86_vm0, %v2203_v48  ;;  %2750 = vmatmul.msk.f32.gmra.mxu0 %vm86_vm0, %v1931_v52 }
 0x2b0   :  { %v930_v11 = vpop.f32.mrf.mxu1  ;;  %v1354_v7 = vpop.f32.mrf.mxu2 }
 0x2b1   :  { %v931_v29 = vadd.f32 %v3597_v42, %v930_v11  ;;  %v1355_v61 = vadd.f32 %v3345_v55, %v1354_v7  ;;  %v1778_v17 = vpop.f32.mrf.mxu3 }
 0x2b2   :  { %v1779_v18 = vadd.f32 %v3506_v58, %v1778_v17 }
 0x2b3   :  { %v1016_v20 = vmax.f32 %v931_v29, 0.0  ;;  %v1474_v47 = vmax.f32 %v1355_v61, 0.0  ;;  %v2205_v24 = vpop.f32.mrf.mxu0 }
 0x2b4   :  { %v1932_v43 = vmax.f32 %v1779_v18, 0.0  ;;  %v2206_v22 = vadd.f32 %v3657_v4, %v2205_v24 }
 0x2b5   :  { %2647 = vmatmul.msk.f32.gmra.mxu2 %vm86_vm0, %v1016_v20  ;;  %2699 = vmatmul.msk.f32.gmra.mxu3 %vm86_vm0, %v1474_v47 }
 0x2b6   :  { %2391 = vst.msk [vmem:[%s4164_s3 + $0x18] sm:$0xff] %vm86_vm0, %v2206_v22  ;;  %2751 = vmatmul.msk.f32.gmra.mxu0 %vm86_vm0, %v1932_v43 }
 0x2b8   :  { %v933_v8 = vpop.f32.mrf.mxu1  ;;  %v1357_v26 = vpop.f32.mrf.mxu2 }
 0x2b9   :  { %v934_v16 = vadd.f32 %v3597_v42, %v933_v8  ;;  %v1358_v33 = vadd.f32 %v3345_v55, %v1357_v26  ;;  %v1781_v25 = vpop.f32.mrf.mxu3 }
 0x2ba   :  { %v1782_v12 = vadd.f32 %v3506_v58, %v1781_v25 }
 0x2bb   :  { %v1017_v53 = vmax.f32 %v934_v16, 0.0  ;;  %v1475_v27 = vmax.f32 %v1358_v33, 0.0  ;;  %v2208_v30 = vpop.f32.mrf.mxu0 }
 0x2bc   :  { %v1933_v31 = vmax.f32 %v1782_v12, 0.0  ;;  %v2209_v21 = vadd.f32 %v3657_v4, %v2208_v30 }
 0x2bd   :  { %2648 = vmatmul.msk.f32.gmra.mxu2 %vm86_vm0, %v1017_v53  ;;  %2700 = vmatmul.msk.f32.gmra.mxu3 %vm86_vm0, %v1475_v27 }
 0x2be   :  { %2392 = vst.msk [vmem:[%s4164_s3 + $0x20] sm:$0xff] %vm86_vm0, %v2209_v21  ;;  %2752 = vmatmul.msk.f32.gmra.mxu0 %vm86_vm0, %v1933_v31 }
 0x2c0   :  { %v936_v55 = vpop.f32.mrf.mxu1  ;;  %v1360_v32 = vpop.f32.mrf.mxu2 }
 0x2c1   :  { %v937_v51 = vadd.f32 %v3597_v42, %v936_v55  ;;  %v1361_v37 = vadd.f32 %v3718_v34, %v1360_v32  ;;  %v1784_v39 = vpop.f32.mrf.mxu3 }
 0x2c2   :  { %v1785_v1 = vadd.f32 %v3506_v58, %v1784_v39 }
 0x2c3   :  { %v1018_v40 = vmax.f32 %v937_v51, 0.0  ;;  %v1476_v36 = vmax.f32 %v1361_v37, 0.0  ;;  %v2211_v44 = vpop.f32.mrf.mxu0 }
 0x2c4   :  { %v1934_v28 = vmax.f32 %v1785_v1, 0.0  ;;  %v2212_v63 = vadd.f32 %v3657_v4, %v2211_v44 }
 0x2c5   :  { %2649 = vmatmul.msk.f32.gmra.mxu2 %vm86_vm0, %v1018_v40  ;;  %2701 = vmatmul.msk.f32.gmra.mxu3 %vm86_vm0, %v1476_v36 }
 0x2c6   :  { %2393 = vst.msk [vmem:[%s4164_s3 + $0x28] sm:$0xff] %vm86_vm0, %v2212_v63  ;;  %2753 = vmatmul.msk.f32.gmra.mxu0 %vm86_vm0, %v1934_v28 }
 0x2c8   :  { %v939_v0 = vpop.f32.mrf.mxu1  ;;  %v1363_v45 = vpop.f32.mrf.mxu2 }
 0x2c9   :  { %v940_v46 = vadd.f32 %v3597_v42, %v939_v0  ;;  %v1364_v49 = vadd.f32 %v3718_v34, %v1363_v45  ;;  %v1787_v35 = vpop.f32.mrf.mxu3 }
 0x2ca   :  { %v1788_v9 = vadd.f32 %v3506_v58, %v1787_v35 }
 0x2cb   :  { %v1019_v2 = vmax.f32 %v940_v46, 0.0  ;;  %v1477_v41 = vmax.f32 %v1364_v49, 0.0  ;;  %v2214_v50 = vpop.f32.mrf.mxu0 }
 0x2cc   :  { %v1935_v56 = vmax.f32 %v1788_v9, 0.0  ;;  %v2215_v57 = vadd.f32 %v3657_v4, %v2214_v50 }
 0x2cd   :  { %2650 = vmatmul.msk.f32.gmra.mxu2 %vm86_vm0, %v1019_v2  ;;  %2702 = vmatmul.msk.f32.gmra.mxu3 %vm86_vm0, %v1477_v41 }
 0x2ce   :  { %2394 = vst.msk [vmem:[%s4164_s3 + $0x30] sm:$0xff] %vm86_vm0, %v2215_v57  ;;  %2754 = vmatmul.msk.f32.gmra.mxu0 %vm86_vm0, %v1935_v56 }
 0x2d0   :  { %v942_v13 = vpop.f32.mrf.mxu1  ;;  %v1366_v38 = vpop.f32.mrf.mxu2 }
 0x2d1   :  { %v943_v19 = vadd.f32 %v3597_v42, %v942_v13  ;;  %v1367_v59 = vadd.f32 %v3718_v34, %v1366_v38  ;;  %v1790_v60 = vpop.f32.mrf.mxu3 }
 0x2d2   :  { %v1791_v54 = vadd.f32 %v3506_v58, %v1790_v60 }
 0x2d3   :  { %v1020_v14 = vmax.f32 %v943_v19, 0.0  ;;  %v1478_v62 = vmax.f32 %v1367_v59, 0.0  ;;  %v2217_v10 = vpop.f32.mrf.mxu0 }
 0x2d4   :  { %v1936_v3 = vmax.f32 %v1791_v54, 0.0  ;;  %v2218_v6 = vadd.f32 %v3657_v4, %v2217_v10 }
 0x2d5   :  { %2651 = vmatmul.msk.f32.gmra.mxu2 %vm86_vm0, %v1020_v14  ;;  %2703 = vmatmul.msk.f32.gmra.mxu3 %vm86_vm0, %v1478_v62 }
 0x2d6   :  { %2395 = vst.msk [vmem:[%s4164_s3 + $0x38] sm:$0xff] %vm86_vm0, %v2218_v6  ;;  %2755 = vmatmul.msk.f32.gmra.mxu0 %vm86_vm0, %v1936_v3 }
 0x2d8   :  { %v945_v23 = vpop.f32.mrf.mxu1  ;;  %v1369_v15 = vpop.f32.mrf.mxu2 }
 0x2d9   :  { %v946_v5 = vadd.f32 %v3597_v42, %v945_v23  ;;  %v1370_v52 = vadd.f32 %v3718_v34, %v1369_v15  ;;  %v1793_v48 = vpop.f32.mrf.mxu3 }
 0x2da   :  { %v1794_v11 = vadd.f32 %v3506_v58, %v1793_v48 }
 0x2db   :  { %v1021_v7 = vmax.f32 %v946_v5, 0.0  ;;  %v1479_v29 = vmax.f32 %v1370_v52, 0.0  ;;  %v2220_v61 = vpop.f32.mrf.mxu0 }
 0x2dc   :  { %v1937_v17 = vmax.f32 %v1794_v11, 0.0  ;;  %v2221_v18 = vadd.f32 %v3657_v4, %v2220_v61 }
 0x2dd   :  { %2652 = vmatmul.msk.f32.gmra.mxu2 %vm86_vm0, %v1021_v7  ;;  %2704 = vmatmul.msk.f32.gmra.mxu3 %vm86_vm0, %v1479_v29 }
 0x2de   :  { %2396 = vst.msk [vmem:[%s4164_s3 + $0x40] sm:$0xff] %vm86_vm0, %v2221_v18  ;;  %2756 = vmatmul.msk.f32.gmra.mxu0 %vm86_vm0, %v1937_v17 }
 0x2e0   :  { %v948_v20 = vpop.f32.mrf.mxu1  ;;  %v1372_v47 = vpop.f32.mrf.mxu2 }
 0x2e1   :  { %v949_v24 = vadd.f32 %v3597_v42, %v948_v20  ;;  %v1373_v43 = vadd.f32 %v3718_v34, %v1372_v47  ;;  %v1796_v22 = vpop.f32.mrf.mxu3 }
 0x2e2   :  { %v1797_v8 = vadd.f32 %v3506_v58, %v1796_v22 }
 0x2e3   :  { %v1022_v26 = vmax.f32 %v949_v24, 0.0  ;;  %v1480_v16 = vmax.f32 %v1373_v43, 0.0  ;;  %v2223_v33 = vpop.f32.mrf.mxu0 }
 0x2e4   :  { %v1938_v25 = vmax.f32 %v1797_v8, 0.0  ;;  %v2224_v12 = vadd.f32 %v3657_v4, %v2223_v33 }
 0x2e5   :  { %2653 = vmatmul.msk.f32.gmra.mxu2 %vm86_vm0, %v1022_v26  ;;  %2705 = vmatmul.msk.f32.gmra.mxu3 %vm86_vm0, %v1480_v16 }
 0x2e6   :  { %2397 = vst.msk [vmem:[%s4164_s3 + $0x48] sm:$0xff] %vm86_vm0, %v2224_v12  ;;  %2757 = vmatmul.msk.f32.gmra.mxu0 %vm86_vm0, %v1938_v25 }
 0x2e8   :  { %v951_v53 = vpop.f32.mrf.mxu1  ;;  %v1375_v27 = vpop.f32.mrf.mxu2 }
 0x2e9   :  { %v952_v30 = vadd.f32 %v3597_v42, %v951_v53  ;;  %v1376_v31 = vadd.f32 %v3718_v34, %v1375_v27  ;;  %v1799_v21 = vpop.f32.mrf.mxu3 }
 0x2ea   :  { %v1800_v55 = vadd.f32 %v3506_v58, %v1799_v21 }
 0x2eb   :  { %v1023_v32 = vmax.f32 %v952_v30, 0.0  ;;  %v1481_v51 = vmax.f32 %v1376_v31, 0.0  ;;  %v2226_v37 = vpop.f32.mrf.mxu0 }
 0x2ec   :  { %v1939_v39 = vmax.f32 %v1800_v55, 0.0  ;;  %v2227_v1 = vadd.f32 %v3657_v4, %v2226_v37 }
 0x2ed   :  { %2654 = vmatmul.msk.f32.gmra.mxu2 %vm86_vm0, %v1023_v32  ;;  %2706 = vmatmul.msk.f32.gmra.mxu3 %vm86_vm0, %v1481_v51 }
 0x2ee   :  { %2398 = vst.msk [vmem:[%s4164_s3 + $0x50] sm:$0xff] %vm86_vm0, %v2227_v1  ;;  %2758 = vmatmul.msk.f32.gmra.mxu0 %vm86_vm0, %v1939_v39 }
 0x2f0   :  { %v954_v40 = vpop.f32.mrf.mxu1  ;;  %v1378_v36 = vpop.f32.mrf.mxu2 }
 0x2f1   :  { %v955_v44 = vadd.f32 %v3597_v42, %v954_v40  ;;  %v1379_v28 = vadd.f32 %v3718_v34, %v1378_v36  ;;  %v1802_v63 = vpop.f32.mrf.mxu3 }
 0x2f2   :  { %v1803_v0 = vadd.f32 %v3506_v58, %v1802_v63 }
 0x2f3   :  { %v1024_v45 = vmax.f32 %v955_v44, 0.0  ;;  %v1482_v46 = vmax.f32 %v1379_v28, 0.0  ;;  %v2229_v49 = vpop.f32.mrf.mxu0 }
 0x2f4   :  { %v1940_v35 = vmax.f32 %v1803_v0, 0.0  ;;  %v2230_v9 = vadd.f32 %v3657_v4, %v2229_v49 }
 0x2f5   :  { %2655 = vmatmul.msk.f32.gmra.mxu2 %vm86_vm0, %v1024_v45  ;;  %2707 = vmatmul.msk.f32.gmra.mxu3 %vm86_vm0, %v1482_v46 }
 0x2f6   :  { %2399 = vst.msk [vmem:[%s4164_s3 + $0x58] sm:$0xff] %vm86_vm0, %v2230_v9  ;;  %2759 = vmatmul.msk.f32.gmra.mxu0 %vm86_vm0, %v1940_v35 }
 0x2f8   :  { %v957_v2 = vpop.f32.mrf.mxu1  ;;  %v1381_v41 = vpop.f32.mrf.mxu2 }
 0x2f9   :  { %v958_v50 = vadd.f32 %v3597_v42, %v957_v2  ;;  %v1382_v56 = vadd.f32 %v3718_v34, %v1381_v41  ;;  %v1805_v57 = vpop.f32.mrf.mxu3 }
 0x2fa   :  { %v1806_v13 = vadd.f32 %v3506_v58, %v1805_v57 }
 0x2fb   :  { %v1025_v38 = vmax.f32 %v958_v50, 0.0  ;;  %v1483_v19 = vmax.f32 %v1382_v56, 0.0  ;;  %v2232_v59 = vpop.f32.mrf.mxu0 }
 0x2fc   :  { %v1941_v60 = vmax.f32 %v1806_v13, 0.0  ;;  %v2233_v54 = vadd.f32 %v3657_v4, %v2232_v59 }
 0x2fd   :  { %2656 = vmatmul.msk.f32.gmra.mxu2 %vm86_vm0, %v1025_v38  ;;  %2708 = vmatmul.msk.f32.gmra.mxu3 %vm86_vm0, %v1483_v19 }
 0x2fe   :  { %2400 = vst.msk [vmem:[%s4164_s3 + $0x60] sm:$0xff] %vm86_vm0, %v2233_v54  ;;  %2760 = vmatmul.msk.f32.gmra.mxu0 %vm86_vm0, %v1941_v60 }
 0x300   :  { %v960_v14 = vpop.f32.mrf.mxu1  ;;  %v1384_v62 = vpop.f32.mrf.mxu2 }
 0x301   :  { %v961_v10 = vadd.f32 %v3597_v42, %v960_v14  ;;  %v1385_v3 = vadd.f32 %v3718_v34, %v1384_v62  ;;  %v1808_v6 = vpop.f32.mrf.mxu3 }
 0x302   :  { %v1809_v23 = vadd.f32 %v3506_v58, %v1808_v6 }
 0x303   :  { %v1026_v15 = vmax.f32 %v961_v10, 0.0  ;;  %v1484_v5 = vmax.f32 %v1385_v3, 0.0  ;;  %v2235_v52 = vpop.f32.mrf.mxu0 }
 0x304   :  { %v1942_v48 = vmax.f32 %v1809_v23, 0.0  ;;  %v2236_v11 = vadd.f32 %v3657_v4, %v2235_v52 }
 0x305   :  { %2657 = vmatmul.msk.f32.gmra.mxu2 %vm86_vm0, %v1026_v15  ;;  %2709 = vmatmul.msk.f32.gmra.mxu3 %vm86_vm0, %v1484_v5 }
 0x306   :  { %2401 = vst.msk [vmem:[%s4164_s3 + $0x68] sm:$0xff] %vm86_vm0, %v2236_v11  ;;  %2761 = vmatmul.msk.f32.gmra.mxu0 %vm86_vm0, %v1942_v48 }
 0x308   :  { %v1387_v42 = vpop.f32.mrf.mxu2 }
 0x309   :  { %v1388_v7 = vadd.f32 %v3718_v34, %v1387_v42  ;;  %v1811_v29 = vpop.f32.mrf.mxu3 }
 0x30a   :  { %v1812_v61 = vadd.f32 %v3506_v58, %v1811_v29 }
 0x30b   :  { %v1485_v17 = vmax.f32 %v1388_v7, 0.0  ;;  %v2238_v18 = vpop.f32.mrf.mxu0 }
 0x30c   :  { %v1943_v20 = vmax.f32 %v1812_v61, 0.0  ;;  %v2239_v47 = vadd.f32 %v3657_v4, %v2238_v18 }
 0x30d   :  { %2710 = vmatmul.msk.f32.gmra.mxu3 %vm86_vm0, %v1485_v17 }
 0x30e   :  { %2402 = vst.msk [vmem:[%s4164_s3 + $0x70] sm:$0xff] %vm86_vm0, %v2239_v47  ;;  %2762 = vmatmul.msk.f32.gmra.mxu0 %vm86_vm0, %v1943_v20 }
 0x310   :  { %v1390_v24 = vpop.f32.mrf.mxu2 }
 0x311   :  { %v1391_v43 = vadd.f32 %v3718_v34, %v1390_v24  ;;  %v1814_v22 = vpop.f32.mrf.mxu3 }
 0x312   :  { %v1815_v8 = vadd.f32 %v3506_v58, %v1814_v22 }
 0x313   :  { %v1486_v26 = vmax.f32 %v1391_v43, 0.0  ;;  %v2241_v16 = vpop.f32.mrf.mxu0 }
 0x314   :  { %v1944_v33 = vmax.f32 %v1815_v8, 0.0  ;;  %v2242_v25 = vadd.f32 %v3657_v4, %v2241_v16 }
 0x315   :  { %2711 = vmatmul.msk.f32.gmra.mxu3 %vm86_vm0, %v1486_v26 }
 0x316   :  { %2403 = vst.msk [vmem:[%s4164_s3 + $0x78] sm:$0xff] %vm86_vm0, %v2242_v25  ;;  %2763 = vmatmul.msk.f32.gmra.mxu0 %vm86_vm0, %v1944_v33 }
 0x318   :  { %v1393_v12 = vpop.f32.mrf.mxu2 }
 0x319   :  { %v1394_v53 = vadd.f32 %v3718_v34, %v1393_v12  ;;  %v1817_v27 = vpop.f32.mrf.mxu3 }
 0x31a   :  { %v1818_v30 = vadd.f32 %v3506_v58, %v1817_v27 }
 0x31b   :  { %v1487_v31 = vmax.f32 %v1394_v53, 0.0  ;;  %v2244_v21 = vpop.f32.mrf.mxu0 }
 0x31c   :  { %v1945_v55 = vmax.f32 %v1818_v30, 0.0  ;;  %v2245_v32 = vadd.f32 %v3657_v4, %v2244_v21 }
 0x31d   :  { %2712 = vmatmul.msk.f32.gmra.mxu3 %vm86_vm0, %v1487_v31 }
 0x31e   :  { %2404 = vst.msk [vmem:[%s4164_s3 + $0x80] sm:$0xff] %vm86_vm0, %v2245_v32  ;;  %2764 = vmatmul.msk.f32.gmra.mxu0 %vm86_vm0, %v1945_v55 }
 0x320   :  { %v1396_v51 = vpop.f32.mrf.mxu2 }
 0x321   :  { %v1397_v37 = vadd.f32 %v3718_v34, %v1396_v51  ;;  %v1820_v39 = vpop.f32.mrf.mxu3 }
 0x322   :  { %v1821_v1 = vadd.f32 %v3506_v58, %v1820_v39 }
 0x323   :  { %v1488_v40 = vmax.f32 %v1397_v37, 0.0  ;;  %v2247_v36 = vpop.f32.mrf.mxu0 }
 0x324   :  { %v1946_v44 = vmax.f32 %v1821_v1, 0.0  ;;  %v2248_v28 = vadd.f32 %v3657_v4, %v2247_v36 }
 0x325   :  { %2713 = vmatmul.msk.f32.gmra.mxu3 %vm86_vm0, %v1488_v40 }
 0x326   :  { %2405 = vst.msk [vmem:[%s4164_s3 + $0x88] sm:$0xff] %vm86_vm0, %v2248_v28  ;;  %2765 = vmatmul.msk.f32.gmra.mxu0 %vm86_vm0, %v1946_v44 }
 0x328   :  { %v1399_v63 = vpop.f32.mrf.mxu2 }
 0x329   :  { %v1400_v0 = vadd.f32 %v3718_v34, %v1399_v63  ;;  %v1823_v45 = vpop.f32.mrf.mxu3 }
 0x32a   :  { %v1824_v46 = vadd.f32 %v3506_v58, %v1823_v45 }
 0x32b   :  { %v1489_v49 = vmax.f32 %v1400_v0, 0.0  ;;  %v2250_v35 = vpop.f32.mrf.mxu0 }
 0x32c   :  { %v1947_v9 = vmax.f32 %v1824_v46, 0.0  ;;  %v2251_v2 = vadd.f32 %v3657_v4, %v2250_v35 }
 0x32d   :  { %2714 = vmatmul.msk.f32.gmra.mxu3 %vm86_vm0, %v1489_v49 }
 0x32e   :  { %2406 = vst.msk [vmem:[%s4164_s3 + $0x90] sm:$0xff] %vm86_vm0, %v2251_v2  ;;  %2766 = vmatmul.msk.f32.gmra.mxu0 %vm86_vm0, %v1947_v9 }
 0x330   :  { %v1402_v41 = vpop.f32.mrf.mxu2 }
 0x331   :  { %v1403_v50 = vadd.f32 %v3718_v34, %v1402_v41  ;;  %v1826_v56 = vpop.f32.mrf.mxu3 }
 0x332   :  { %v1827_v57 = vadd.f32 %v3506_v58, %v1826_v56  ;;  %v3876_v58 = vld [vmem:[%s4163_s2 + $0x3] ss:$0 sm:$0xff] }
 0x333   :  { %v1490_v13 = vmax.f32 %v1403_v50, 0.0  ;;  %v2253_v38 = vpop.f32.mrf.mxu0 }
 0x334   :  { %v1948_v19 = vmax.f32 %v1827_v57, 0.0  ;;  %v2254_v59 = vadd.f32 %v3657_v4, %v2253_v38 }
 0x335   :  { %2715 = vmatmul.msk.f32.gmra.mxu3 %vm86_vm0, %v1490_v13 }
 0x336   :  { %2407 = vst.msk [vmem:[%s4164_s3 + $0x98] sm:$0xff] %vm86_vm0, %v2254_v59  ;;  %2767 = vmatmul.msk.f32.gmra.mxu0 %vm86_vm0, %v1948_v19 }
 0x338   :  { %v1405_v60 = vpop.f32.mrf.mxu2 }
 0x339   :  { %v1406_v54 = vadd.f32 %v3718_v34, %v1405_v60  ;;  %v1829_v14 = vpop.f32.mrf.mxu3 }
 0x33a   :  { %v1830_v62 = vadd.f32 %v3876_v58, %v1829_v14 }
 0x33b   :  { %v1491_v10 = vmax.f32 %v1406_v54, 0.0  ;;  %v2256_v3 = vpop.f32.mrf.mxu0 }
 0x33c   :  { %v1949_v6 = vmax.f32 %v1830_v62, 0.0  ;;  %v2257_v23 = vadd.f32 %v3657_v4, %v2256_v3 }
 0x33d   :  { %2716 = vmatmul.msk.f32.gmra.mxu3 %vm86_vm0, %v1491_v10 }
 0x33e   :  { %2408 = vst.msk [vmem:[%s4164_s3 + $0xa0] sm:$0xff] %vm86_vm0, %v2257_v23  ;;  %2768 = vmatmul.msk.f32.gmra.mxu0 %vm86_vm0, %v1949_v6 }
 0x340   :  { %v1408_v15 = vpop.f32.mrf.mxu2 }
 0x341   :  { %v1409_v5 = vadd.f32 %v3718_v34, %v1408_v15  ;;  %v1832_v52 = vpop.f32.mrf.mxu3 }
 0x342   :  { %v1833_v48 = vadd.f32 %v3876_v58, %v1832_v52 }
 0x343   :  { %v1492_v11 = vmax.f32 %v1409_v5, 0.0  ;;  %v2259_v42 = vpop.f32.mrf.mxu0 }
 0x344   :  { %v1950_v7 = vmax.f32 %v1833_v48, 0.0  ;;  %v2260_v29 = vadd.f32 %v3657_v4, %v2259_v42 }
 0x345   :  { %2717 = vmatmul.msk.f32.gmra.mxu3 %vm86_vm0, %v1492_v11 }
 0x346   :  { %2409 = vst.msk [vmem:[%s4164_s3 + $0xa8] sm:$0xff] %vm86_vm0, %v2260_v29  ;;  %2769 = vmatmul.msk.f32.gmra.mxu0 %vm86_vm0, %v1950_v7 }
 0x348   :  { %v1411_v61 = vpop.f32.mrf.mxu2 }
 0x349   :  { %v1412_v17 = vadd.f32 %v3718_v34, %v1411_v61  ;;  %v1835_v18 = vpop.f32.mrf.mxu3 }
 0x34a   :  { %v1836_v20 = vadd.f32 %v3876_v58, %v1835_v18 }
 0x34b   :  { %v1493_v47 = vmax.f32 %v1412_v17, 0.0  ;;  %v2262_v24 = vpop.f32.mrf.mxu0 }
 0x34c   :  { %v1951_v43 = vmax.f32 %v1836_v20, 0.0  ;;  %v2263_v22 = vadd.f32 %v3657_v4, %v2262_v24 }
 0x34d   :  { %2718 = vmatmul.msk.f32.gmra.mxu3 %vm86_vm0, %v1493_v47 }
 0x34e   :  { %2410 = vst.msk [vmem:[%s4164_s3 + $0xb0] sm:$0xff] %vm86_vm0, %v2263_v22  ;;  %2770 = vmatmul.msk.f32.gmra.mxu0 %vm86_vm0, %v1951_v43 }
 0x350   :  { %v1414_v8 = vpop.f32.mrf.mxu2 }
 0x351   :  { %v1415_v26 = vadd.f32 %v3718_v34, %v1414_v8  ;;  %v1838_v16 = vpop.f32.mrf.mxu3 }
 0x352   :  { %v1839_v33 = vadd.f32 %v3876_v58, %v1838_v16 }
 0x353   :  { %v1494_v25 = vmax.f32 %v1415_v26, 0.0  ;;  %v2265_v12 = vpop.f32.mrf.mxu0 }
 0x354   :  { %v1952_v53 = vmax.f32 %v1839_v33, 0.0  ;;  %v2266_v27 = vadd.f32 %v3657_v4, %v2265_v12 }
 0x355   :  { %2719 = vmatmul.msk.f32.gmra.mxu3 %vm86_vm0, %v1494_v25 }
 0x356   :  { %2411 = vst.msk [vmem:[%s4164_s3 + $0xb8] sm:$0xff] %vm86_vm0, %v2266_v27  ;;  %2771 = vmatmul.msk.f32.gmra.mxu0 %vm86_vm0, %v1952_v53 }
 0x358   :  { %v1417_v30 = vpop.f32.mrf.mxu2 }
 0x359   :  { %v1418_v31 = vadd.f32 %v3718_v34, %v1417_v30  ;;  %v1841_v21 = vpop.f32.mrf.mxu3 }
 0x35a   :  { %v1842_v55 = vadd.f32 %v3876_v58, %v1841_v21 }
 0x35b   :  { %v1495_v32 = vmax.f32 %v1418_v31, 0.0  ;;  %v2268_v51 = vpop.f32.mrf.mxu0 }
 0x35c   :  { %v1953_v37 = vmax.f32 %v1842_v55, 0.0  ;;  %v2269_v39 = vadd.f32 %v3657_v4, %v2268_v51 }
 0x35d   :  { %2720 = vmatmul.msk.f32.gmra.mxu3 %vm86_vm0, %v1495_v32 }
 0x35e   :  { %2412 = vst.msk [vmem:[%s4164_s3 + $0xc0] sm:$0xff] %vm86_vm0, %v2269_v39  ;;  %2772 = vmatmul.msk.f32.gmra.mxu0 %vm86_vm0, %v1953_v37 }
 0x360   :  { %v1420_v1 = vpop.f32.mrf.mxu2 }
 0x361   :  { %v1421_v40 = vadd.f32 %v3718_v34, %v1420_v1  ;;  %v1844_v36 = vpop.f32.mrf.mxu3 }
 0x362   :  { %v1845_v44 = vadd.f32 %v3876_v58, %v1844_v36 }
 0x363   :  { %v1496_v28 = vmax.f32 %v1421_v40, 0.0  ;;  %v2271_v63 = vpop.f32.mrf.mxu0 }
 0x364   :  { %v1954_v0 = vmax.f32 %v1845_v44, 0.0  ;;  %v2272_v45 = vadd.f32 %v3657_v4, %v2271_v63 }
 0x365   :  { %2721 = vmatmul.msk.f32.gmra.mxu3 %vm86_vm0, %v1496_v28 }
 0x366   :  { %2413 = vst.msk [vmem:[%s4164_s3 + $0xc8] sm:$0xff] %vm86_vm0, %v2272_v45  ;;  %2773 = vmatmul.msk.f32.gmra.mxu0 %vm86_vm0, %v1954_v0 }
 0x368   :  { %v1423_v46 = vpop.f32.mrf.mxu2 }
 0x369   :  { %v1424_v49 = vadd.f32 %v3718_v34, %v1423_v46  ;;  %v1847_v35 = vpop.f32.mrf.mxu3 }
 0x36a   :  { %v1848_v9 = vadd.f32 %v3876_v58, %v1847_v35 }
 0x36b   :  { %v1497_v2 = vmax.f32 %v1424_v49, 0.0  ;;  %v2274_v41 = vpop.f32.mrf.mxu0 }
 0x36c   :  { %v1955_v50 = vmax.f32 %v1848_v9, 0.0  ;;  %v2275_v56 = vadd.f32 %v3657_v4, %v2274_v41 }
 0x36d   :  { %2722 = vmatmul.msk.f32.gmra.mxu3 %vm86_vm0, %v1497_v2 }
 0x36e   :  { %2414 = vst.msk [vmem:[%s4164_s3 + $0xd0] sm:$0xff] %vm86_vm0, %v2275_v56  ;;  %2774 = vmatmul.msk.f32.gmra.mxu0 %vm86_vm0, %v1955_v50 }
 0x370   :  { %v1426_v57 = vpop.f32.mrf.mxu2 }
 0x371   :  { %v1427_v13 = vadd.f32 %v3718_v34, %v1426_v57  ;;  %v1850_v38 = vpop.f32.mrf.mxu3 }
 0x372   :  { %v1851_v19 = vadd.f32 %v3876_v58, %v1850_v38 }
 0x373   :  { %v1498_v59 = vmax.f32 %v1427_v13, 0.0  ;;  %v2277_v60 = vpop.f32.mrf.mxu0 }
 0x374   :  { %v1956_v54 = vmax.f32 %v1851_v19, 0.0  ;;  %v2278_v14 = vadd.f32 %v3657_v4, %v2277_v60 }
 0x375   :  { %2723 = vmatmul.msk.f32.gmra.mxu3 %vm86_vm0, %v1498_v59 }
 0x376   :  { %2415 = vst.msk [vmem:[%s4164_s3 + $0xd8] sm:$0xff] %vm86_vm0, %v2278_v14  ;;  %2775 = vmatmul.msk.f32.gmra.mxu0 %vm86_vm0, %v1956_v54 }
 0x378   :  { %v1429_v62 = vpop.f32.mrf.mxu2 }
 0x379   :  { %v1430_v10 = vadd.f32 %v3718_v34, %v1429_v62  ;;  %v1853_v3 = vpop.f32.mrf.mxu3 }
 0x37a   :  { %v1854_v6 = vadd.f32 %v3876_v58, %v1853_v3 }
 0x37b   :  { %v1499_v23 = vmax.f32 %v1430_v10, 0.0  ;;  %v2280_v15 = vpop.f32.mrf.mxu0 }
 0x37c   :  { %v1957_v5 = vmax.f32 %v1854_v6, 0.0  ;;  %v2281_v52 = vadd.f32 %v3657_v4, %v2280_v15 }
 0x37d   :  { %2724 = vmatmul.msk.f32.gmra.mxu3 %vm86_vm0, %v1499_v23 }
 0x37e   :  { %2416 = vst.msk [vmem:[%s4164_s3 + $0xe0] sm:$0xff] %vm86_vm0, %v2281_v52  ;;  %2776 = vmatmul.msk.f32.gmra.mxu0 %vm86_vm0, %v1957_v5 }
 0x380   :  { %v1432_v48 = vpop.f32.mrf.mxu2 }
 0x381   :  { %v1433_v11 = vadd.f32 %v3718_v34, %v1432_v48  ;;  %v1856_v42 = vpop.f32.mrf.mxu3 }
 0x382   :  { %v1857_v7 = vadd.f32 %v3876_v58, %v1856_v42 }
 0x383   :  { %v1500_v29 = vmax.f32 %v1433_v11, 0.0  ;;  %v2283_v61 = vpop.f32.mrf.mxu0 }
 0x384   :  { %v1958_v17 = vmax.f32 %v1857_v7, 0.0  ;;  %v2284_v18 = vadd.f32 %v3657_v4, %v2283_v61 }
 0x385   :  { %2725 = vmatmul.msk.f32.gmra.mxu3 %vm86_vm0, %v1500_v29 }
 0x386   :  { %2417 = vst.msk [vmem:[%s4164_s3 + $0xe8] sm:$0xff] %vm86_vm0, %v2284_v18  ;;  %2777 = vmatmul.msk.f32.gmra.mxu0 %vm86_vm0, %v1958_v17 }
 0x388   :  { %v1435_v20 = vpop.f32.mrf.mxu2 }
 0x389   :  { %v1436_v47 = vadd.f32 %v3718_v34, %v1435_v20  ;;  %v1859_v24 = vpop.f32.mrf.mxu3 }
 0x38a   :  { %v1860_v43 = vadd.f32 %v3876_v58, %v1859_v24 }
 0x38b   :  { %v1501_v22 = vmax.f32 %v1436_v47, 0.0  ;;  %v2286_v8 = vpop.f32.mrf.mxu0 }
 0x38c   :  { %v1959_v26 = vmax.f32 %v1860_v43, 0.0  ;;  %v2287_v16 = vadd.f32 %v3657_v4, %v2286_v8 }
 0x38d   :  { %2726 = vmatmul.msk.f32.gmra.mxu3 %vm86_vm0, %v1501_v22 }
 0x38e   :  { %2418 = vst.msk [vmem:[%s4164_s3 + $0xf0] sm:$0xff] %vm86_vm0, %v2287_v16  ;;  %2778 = vmatmul.msk.f32.gmra.mxu0 %vm86_vm0, %v1959_v26 }
 0x391   :  { %v1862_v33 = vpop.f32.mrf.mxu3 }
 0x392   :  { %v1863_v34 = vadd.f32 %v3876_v58, %v1862_v33 }
 0x393   :  { %v2289_v25 = vpop.f32.mrf.mxu0 }
 0x394   :  { %v1960_v12 = vmax.f32 %v1863_v34, 0.0  ;;  %v2290_v53 = vadd.f32 %v3657_v4, %v2289_v25 }
 0x396   :  { %2419 = vst.msk [vmem:[%s4164_s3 + $0xf8] sm:$0xff] %vm86_vm0, %v2290_v53  ;;  %2779 = vmatmul.msk.f32.gmra.mxu0 %vm86_vm0, %v1960_v12 }
 0x399   :  { %v1865_v27 = vpop.f32.mrf.mxu3 }
 0x39a   :  { %v1866_v30 = vadd.f32 %v3876_v58, %v1865_v27 }
 0x39b   :  { %v2292_v31 = vpop.f32.mrf.mxu0 }
 0x39c   :  { %v1961_v21 = vmax.f32 %v1866_v30, 0.0  ;;  %v2293_v55 = vadd.f32 %v3657_v4, %v2292_v31 }
 0x39e   :  { %2420 = vst.msk [vmem:[%s4164_s3 + $0x100] sm:$0xff] %vm86_vm0, %v2293_v55  ;;  %2780 = vmatmul.msk.f32.gmra.mxu0 %vm86_vm0, %v1961_v21 }
 0x3a1   :  { %v1868_v32 = vpop.f32.mrf.mxu3 }
 0x3a2   :  { %v1869_v51 = vadd.f32 %v3876_v58, %v1868_v32 }
 0x3a3   :  { %v2295_v37 = vpop.f32.mrf.mxu0 }
 0x3a4   :  { %v1962_v39 = vmax.f32 %v1869_v51, 0.0  ;;  %v2296_v1 = vadd.f32 %v3657_v4, %v2295_v37 }
 0x3a6   :  { %2421 = vst.msk [vmem:[%s4164_s3 + $0x108] sm:$0xff] %vm86_vm0, %v2296_v1  ;;  %2781 = vmatmul.msk.f32.gmra.mxu0 %vm86_vm0, %v1962_v39 }
 0x3a9   :  { %v1871_v40 = vpop.f32.mrf.mxu3 }
 0x3aa   :  { %v1872_v36 = vadd.f32 %v3876_v58, %v1871_v40 }
 0x3ab   :  { %v2298_v44 = vpop.f32.mrf.mxu0 }
 0x3ac   :  { %v1963_v28 = vmax.f32 %v1872_v36, 0.0  ;;  %v2299_v63 = vadd.f32 %v3657_v4, %v2298_v44 }
 0x3ae   :  { %2422 = vst.msk [vmem:[%s4164_s3 + $0x110] sm:$0xff] %vm86_vm0, %v2299_v63  ;;  %2782 = vmatmul.msk.f32.gmra.mxu0 %vm86_vm0, %v1963_v28 }
 0x3b1   :  { %v1874_v0 = vpop.f32.mrf.mxu3 }
 0x3b2   :  { %v1875_v45 = vadd.f32 %v3876_v58, %v1874_v0 }
 0x3b3   :  { %v2301_v46 = vpop.f32.mrf.mxu0 }
 0x3b4   :  { %v1964_v49 = vmax.f32 %v1875_v45, 0.0  ;;  %v2302_v35 = vadd.f32 %v3657_v4, %v2301_v46  ;;  %v2817_v46 = vld [vmem:[%s4163_s2 + $0x4] ss:$0 sm:$0xff] }
 0x3b6   :  { %2423 = vst.msk [vmem:[%s4164_s3 + $0x118] sm:$0xff] %vm86_vm0, %v2302_v35  ;;  %2783 = vmatmul.msk.f32.gmra.mxu0 %vm86_vm0, %v1964_v49 }
 0x3b9   :  { %v1877_v9 = vpop.f32.mrf.mxu3 }
 0x3ba   :  { %v1878_v2 = vadd.f32 %v3876_v58, %v1877_v9 }
 0x3bb   :  { %v2304_v41 = vpop.f32.mrf.mxu0 }
 0x3bc   :  { %v1965_v50 = vmax.f32 %v1878_v2, 0.0  ;;  %v2305_v56 = vadd.f32 %v3657_v4, %v2304_v41 }
 0x3be   :  { %2424 = vst.msk [vmem:[%s4164_s3 + $0x120] sm:$0xff] %vm86_vm0, %v2305_v56  ;;  %2784 = vmatmul.msk.f32.gmra.mxu0 %vm86_vm0, %v1965_v50 }
 0x3c1   :  { %v1880_v57 = vpop.f32.mrf.mxu3 }
 0x3c2   :  { %v1881_v13 = vadd.f32 %v3876_v58, %v1880_v57 }
 0x3c3   :  { %v2307_v38 = vpop.f32.mrf.mxu0 }
 0x3c4   :  { %v1966_v19 = vmax.f32 %v1881_v13, 0.0  ;;  %v2308_v59 = vadd.f32 %v3657_v4, %v2307_v38 }
 0x3c6   :  { %2425 = vst.msk [vmem:[%s4164_s3 + $0x128] sm:$0xff] %vm86_vm0, %v2308_v59  ;;  %2785 = vmatmul.msk.f32.gmra.mxu0 %vm86_vm0, %v1966_v19 }
 0x3c9   :  { %v1883_v60 = vpop.f32.mrf.mxu3 }
 0x3ca   :  { %v1884_v54 = vadd.f32 %v3876_v58, %v1883_v60 }
 0x3cb   :  { %v2310_v14 = vpop.f32.mrf.mxu0 }
 0x3cc   :  { %v1967_v62 = vmax.f32 %v1884_v54, 0.0  ;;  %v2311_v10 = vadd.f32 %v3657_v4, %v2310_v14 }
 0x3ce   :  { %2426 = vst.msk [vmem:[%s4164_s3 + $0x130] sm:$0xff] %vm86_vm0, %v2311_v10  ;;  %2786 = vmatmul.msk.f32.gmra.mxu0 %vm86_vm0, %v1967_v62 }
 0x3d1   :  { %v1886_v3 = vpop.f32.mrf.mxu3 }
 0x3d2   :  { %v1887_v6 = vadd.f32 %v3876_v58, %v1886_v3 }
 0x3d3   :  { %v2313_v23 = vpop.f32.mrf.mxu0 }
 0x3d4   :  { %v1968_v15 = vmax.f32 %v1887_v6, 0.0  ;;  %v2314_v5 = vadd.f32 %v3657_v4, %v2313_v23 }
 0x3d6   :  { %2427 = vst.msk [vmem:[%s4164_s3 + $0x138] sm:$0xff] %vm86_vm0, %v2314_v5  ;;  %2787 = vmatmul.msk.f32.gmra.mxu0 %vm86_vm0, %v1968_v15 }
 0x3d9   :  { %v1889_v52 = vpop.f32.mrf.mxu3 }
 0x3da   :  { %v1890_v48 = vadd.f32 %v3876_v58, %v1889_v52 }
 0x3db   :  { %v2316_v11 = vpop.f32.mrf.mxu0 }
 0x3dc   :  { %v1969_v42 = vmax.f32 %v1890_v48, 0.0  ;;  %v2317_v7 = vadd.f32 %v3657_v4, %v2316_v11 }
 0x3de   :  { %2428 = vst.msk [vmem:[%s4164_s3 + $0x140] sm:$0xff] %vm86_vm0, %v2317_v7  ;;  %2788 = vmatmul.msk.f32.gmra.mxu0 %vm86_vm0, %v1969_v42 }
 0x3e1   :  { %v1892_v29 = vpop.f32.mrf.mxu3 }
 0x3e2   :  { %v1893_v61 = vadd.f32 %v3876_v58, %v1892_v29 }
 0x3e3   :  { %v2319_v17 = vpop.f32.mrf.mxu0 }
 0x3e4   :  { %v1970_v18 = vmax.f32 %v1893_v61, 0.0  ;;  %v2320_v20 = vadd.f32 %v3657_v4, %v2319_v17 }
 0x3e6   :  { %2429 = vst.msk [vmem:[%s4164_s3 + $0x148] sm:$0xff] %vm86_vm0, %v2320_v20  ;;  %2789 = vmatmul.msk.f32.gmra.mxu0 %vm86_vm0, %v1970_v18 }
 0x3e9   :  { %v1895_v47 = vpop.f32.mrf.mxu3 }
 0x3ea   :  { %v1896_v24 = vadd.f32 %v3876_v58, %v1895_v47 }
 0x3eb   :  { %v2322_v43 = vpop.f32.mrf.mxu0 }
 0x3ec   :  { %v1971_v22 = vmax.f32 %v1896_v24, 0.0  ;;  %v2323_v8 = vadd.f32 %v3657_v4, %v2322_v43 }
 0x3ee   :  { %2430 = vst.msk [vmem:[%s4164_s3 + $0x150] sm:$0xff] %vm86_vm0, %v2323_v8  ;;  %2790 = vmatmul.msk.f32.gmra.mxu0 %vm86_vm0, %v1971_v22 }
 0x3f1   :  { %v1898_v26 = vpop.f32.mrf.mxu3 }
 0x3f2   :  { %v1899_v16 = vadd.f32 %v3876_v58, %v1898_v26 }
 0x3f3   :  { %v2325_v33 = vpop.f32.mrf.mxu0 }
 0x3f4   :  { %v1972_v34 = vmax.f32 %v1899_v16, 0.0  ;;  %v2326_v25 = vadd.f32 %v3657_v4, %v2325_v33 }
 0x3f6   :  { %2431 = vst.msk [vmem:[%s4164_s3 + $0x158] sm:$0xff] %vm86_vm0, %v2326_v25  ;;  %2791 = vmatmul.msk.f32.gmra.mxu0 %vm86_vm0, %v1972_v34 }
 0x3f9   :  { %v1901_v12 = vpop.f32.mrf.mxu3 }
 0x3fa   :  { %v1902_v53 = vadd.f32 %v3876_v58, %v1901_v12 }
 0x3fb   :  { %v2328_v27 = vpop.f32.mrf.mxu0 }
 0x3fc   :  { %v1973_v30 = vmax.f32 %v1902_v53, 0.0  ;;  %v2329_v31 = vadd.f32 %v3657_v4, %v2328_v27 }
 0x3fe   :  { %2432 = vst.msk [vmem:[%s4164_s3 + $0x160] sm:$0xff] %vm86_vm0, %v2329_v31  ;;  %2792 = vmatmul.msk.f32.gmra.mxu0 %vm86_vm0, %v1973_v30 }
 0x401   :  { %v1904_v21 = vpop.f32.mrf.mxu3 }
 0x402   :  { %v1905_v55 = vadd.f32 %v3876_v58, %v1904_v21 }
 0x403   :  { %v2331_v32 = vpop.f32.mrf.mxu0 }
 0x404   :  { %v1974_v51 = vmax.f32 %v1905_v55, 0.0  ;;  %v2332_v37 = vadd.f32 %v3657_v4, %v2331_v32 }
 0x406   :  { %2433 = vst.msk [vmem:[%s4164_s3 + $0x168] sm:$0xff] %vm86_vm0, %v2332_v37  ;;  %2793 = vmatmul.msk.f32.gmra.mxu0 %vm86_vm0, %v1974_v51 }
 0x409   :  { %v1907_v39 = vpop.f32.mrf.mxu3 }
 0x40a   :  { %v1908_v1 = vadd.f32 %v3876_v58, %v1907_v39 }
 0x40b   :  { %v2334_v40 = vpop.f32.mrf.mxu0 }
 0x40c   :  { %v1975_v36 = vmax.f32 %v1908_v1, 0.0  ;;  %v2335_v44 = vadd.f32 %v3657_v4, %v2334_v40 }
 0x40e   :  { %2434 = vst.msk [vmem:[%s4164_s3 + $0x170] sm:$0xff] %vm86_vm0, %v2335_v44  ;;  %2794 = vmatmul.msk.f32.gmra.mxu0 %vm86_vm0, %v1975_v36 }
 0x411   :  { %v1910_v28 = vpop.f32.mrf.mxu3 }
 0x412   :  { %v1911_v63 = vadd.f32 %v3876_v58, %v1910_v28 }
 0x413   :  { %v2337_v0 = vpop.f32.mrf.mxu0 }
 0x414   :  { %v1976_v45 = vmax.f32 %v1911_v63, 0.0  ;;  %v2338_v49 = vadd.f32 %v2817_v46, %v2337_v0 }
 0x416   :  { %2435 = vst.msk [vmem:[%s4164_s3 + $0x178] sm:$0xff] %vm86_vm0, %v2338_v49  ;;  %2795 = vmatmul.msk.f32.gmra.mxu0 %vm86_vm0, %v1976_v45 }
 0x41b   :  { %v2340_v4 = vpop.f32.mrf.mxu0 }
 0x41c   :  { %v2341_v35 = vadd.f32 %v2817_v46, %v2340_v4 }
 0x41e   :  { %2436 = vst.msk [vmem:[%s4164_s3 + $0x180] sm:$0xff] %vm86_vm0, %v2341_v35 }
 0x423   :  { %v2343_v58 = vpop.f32.mrf.mxu0 }
 0x424   :  { %v2344_v9 = vadd.f32 %v2817_v46, %v2343_v58 }
 0x426   :  { %2437 = vst.msk [vmem:[%s4164_s3 + $0x188] sm:$0xff] %vm86_vm0, %v2344_v9 }
 0x42b   :  { %v2346_v2 = vpop.f32.mrf.mxu0 }
 0x42c   :  { %v2347_v41 = vadd.f32 %v2817_v46, %v2346_v2 }
 0x42e   :  { %2438 = vst.msk [vmem:[%s4164_s3 + $0x190] sm:$0xff] %vm86_vm0, %v2347_v41 }
 0x433   :  { %v2349_v50 = vpop.f32.mrf.mxu0 }
 0x434   :  { %v2350_v56 = vadd.f32 %v2817_v46, %v2349_v50 }
 0x436   :  { %2439 = vst.msk [vmem:[%s4164_s3 + $0x198] sm:$0xff] %vm86_vm0, %v2350_v56 }
 0x43b   :  { %v2352_v57 = vpop.f32.mrf.mxu0 }
 0x43c   :  { %v2353_v13 = vadd.f32 %v2817_v46, %v2352_v57 }
 0x43e   :  { %2440 = vst.msk [vmem:[%s4164_s3 + $0x1a0] sm:$0xff] %vm86_vm0, %v2353_v13 }
 0x443   :  { %v2355_v38 = vpop.f32.mrf.mxu0 }
 0x444   :  { %v2356_v19 = vadd.f32 %v2817_v46, %v2355_v38 }
 0x446   :  { %2441 = vst.msk [vmem:[%s4164_s3 + $0x1a8] sm:$0xff] %vm86_vm0, %v2356_v19 }
 0x44b   :  { %v2358_v59 = vpop.f32.mrf.mxu0 }
 0x44c   :  { %v2359_v60 = vadd.f32 %v2817_v46, %v2358_v59 }
 0x44e   :  { %2442 = vst.msk [vmem:[%s4164_s3 + $0x1b0] sm:$0xff] %vm86_vm0, %v2359_v60 }
 0x453   :  { %v2361_v54 = vpop.f32.mrf.mxu0 }
 0x454   :  { %v2362_v14 = vadd.f32 %v2817_v46, %v2361_v54 }
 0x456   :  { %2443 = vst.msk [vmem:[%s4164_s3 + $0x1b8] sm:$0xff] %vm86_vm0, %v2362_v14 }
 0x45b   :  { %v2364_v62 = vpop.f32.mrf.mxu0 }
 0x45c   :  { %v2365_v10 = vadd.f32 %v2817_v46, %v2364_v62 }
 0x45e   :  { %2444 = vst.msk [vmem:[%s4164_s3 + $0x1c0] sm:$0xff] %vm86_vm0, %v2365_v10 }
 0x463   :  { %v2367_v3 = vpop.f32.mrf.mxu0 }
 0x464   :  { %v2368_v6 = vadd.f32 %v2817_v46, %v2367_v3 }
 0x466   :  { %2445 = vst.msk [vmem:[%s4164_s3 + $0x1c8] sm:$0xff] %vm86_vm0, %v2368_v6 }
 0x46b   :  { %v2370_v23 = vpop.f32.mrf.mxu0 }
 0x46c   :  { %v2371_v15 = vadd.f32 %v2817_v46, %v2370_v23 }
 0x46e   :  { %2446 = vst.msk [vmem:[%s4164_s3 + $0x1d0] sm:$0xff] %vm86_vm0, %v2371_v15 }
 0x473   :  { %v2373_v5 = vpop.f32.mrf.mxu0 }
 0x474   :  { %v2374_v52 = vadd.f32 %v2817_v46, %v2373_v5 }
 0x476   :  { %2447 = vst.msk [vmem:[%s4164_s3 + $0x1d8] sm:$0xff] %vm86_vm0, %v2374_v52 }
 0x47b   :  { %v2376_v48 = vpop.f32.mrf.mxu0 }
 0x47c   :  { %v2377_v11 = vadd.f32 %v2817_v46, %v2376_v48 }
 0x47e   :  { %2448 = vst.msk [vmem:[%s4164_s3 + $0x1e0] sm:$0xff] %vm86_vm0, %v2377_v11 }
 0x483   :  { %v2379_v42 = vpop.f32.mrf.mxu0 }
 0x484   :  { %v2380_v7 = vadd.f32 %v2817_v46, %v2379_v42 }
 0x486   :  { %2449 = vst.msk [vmem:[%s4164_s3 + $0x1e8] sm:$0xff] %vm86_vm0, %v2380_v7 }
 0x48b   :  { %v2382_v29 = vpop.f32.mrf.mxu0 }
 0x48c   :  { %v2383_v61 = vadd.f32 %v2817_v46, %v2382_v29 }
 0x48e   :  { %2450 = vst.msk [vmem:[%s4164_s3 + $0x1f0] sm:$0xff] %vm86_vm0, %v2383_v61 }
 0x493   :  { %v2385_v17 = vpop.f32.mrf.mxu0 }
 0x494   :  { %v2386_v18 = vadd.f32 %v2817_v46, %v2385_v17 }
 0x496   :  { %2451 = vst.msk [vmem:[%s4164_s3 + $0x1f8] sm:$0xff] %vm86_vm0, %v2386_v18 }

</bundles_post_ra>
